<compile_context>
chip_gen: v7x
topology: tpu7x:2x2x1
jax: 0.10.0
libtpu: 0.0.40
codegen_flags: <defaults>
</compile_context>

<pallas_src>
import functools
import math

import jax
import jax.numpy as jnp
from jax.experimental import pallas as pl
from jax.experimental.pallas import tpu as pltpu


def _encoder_layer_kernel(x_ref, mask_ref,
                          wqkv_ref, bqkv_ref, wo_ref, bo_ref,
                          ln1_g_ref, ln1_b_ref,
                          w1_ref, b1_ref, w2_ref, b2_ref,
                          ln2_g_ref, ln2_b_ref,
                          out_ref, *, batch, seq_len, n_heads, scale_inv, eps):
    B, L, H = batch, seq_len, n_heads
    D = x_ref.shape[-1]
    Dh = D // H

    x2d = x_ref[...]                                     # (B*L, D) f32

    # ---- fused QKV projection: one MXU matmul, bf16 in / f32 accumulation ----
    qkv = jnp.dot(x2d.astype(jnp.bfloat16), wqkv_ref[...],
                  preferred_element_type=jnp.float32) + bqkv_ref[...]   # (B*L, 3D)

    # Key-padding mask, hoisted out of the head loop. (B, 1, L) bool.
    key_masked = (mask_ref[...][:, None, :] == 0.0)

    wo = wo_ref[...]                                     # (D, D) bf16
    attn_out = jnp.zeros((B * L, D), jnp.float32)

    # ---- multi-head attention (static head loop, all VMEM-resident) ----
    for h in range(H):
        q = qkv[:, h * Dh:(h + 1) * Dh].reshape(B, L, Dh)
        k = qkv[:, D + h * Dh:D + (h + 1) * Dh].reshape(B, L, Dh)
        v = qkv[:, 2 * D + h * Dh:2 * D + (h + 1) * Dh].reshape(B, L, Dh)

        # energy = Q K^T / sqrt(Dh)
        e = jnp.einsum('bqd,bkd->bqk',
                       q.astype(jnp.bfloat16), k.astype(jnp.bfloat16),
                       preferred_element_type=jnp.float32) * scale_inv
        e = jnp.where(key_masked, -1.0e10, e)            # masked_fill(mask==0, -1e10)
        e = e - jnp.max(e, axis=-1, keepdims=True)       # stable softmax (f32)
        p = jnp.exp(e)
        p = p * pl.reciprocal(jnp.sum(p, axis=-1, keepdims=True), approx=True)

        ctx = jnp.einsum('bqk,bkd->bqd',
                         p.astype(jnp.bfloat16), v.astype(jnp.bfloat16),
                         preferred_element_type=jnp.float32)            # (B, L, Dh)

        # fold this head's slice of fc_o straight into the accumulator
        attn_out = attn_out + jnp.dot(
            ctx.reshape(B * L, Dh).astype(jnp.bfloat16),
            wo[h * Dh:(h + 1) * Dh, :],
            preferred_element_type=jnp.float32)
    attn_out = attn_out + bo_ref[...]

    # ---- residual + LayerNorm 1 (f32) ----
    h1 = x2d + attn_out
    mu = jnp.mean(h1, axis=-1, keepdims=True)
    var = jnp.mean((h1 - mu) ** 2, axis=-1, keepdims=True)
    h1 = (h1 - mu) * jax.lax.rsqrt(var + eps) * ln1_g_ref[...] + ln1_b_ref[...]

    # ---- positionwise feed-forward ----
    f = jnp.dot(h1.astype(jnp.bfloat16), w1_ref[...],
                preferred_element_type=jnp.float32) + b1_ref[...]
    f = jnp.maximum(f, 0.0)
    f = jnp.dot(f.astype(jnp.bfloat16), w2_ref[...],
                preferred_element_type=jnp.float32) + b2_ref[...]

    # ---- residual + LayerNorm 2 ----
    y = h1 + f
    mu = jnp.mean(y, axis=-1, keepdims=True)
    var = jnp.mean((y - mu) ** 2, axis=-1, keepdims=True)
    y = (y - mu) * jax.lax.rsqrt(var + eps) * ln2_g_ref[...] + ln2_b_ref[...]

    out_ref[...] = y


def encoder_layer_forward(params, src, src_mask, *, n_heads, eps=1e-5):
    """src: (B, L, D) f32; src_mask: (B, 1, 1, L) key-padding mask (nonzero=keep)."""
    B, L, D = src.shape
    Dh = D // n_heads
    x2d = src.reshape(B * L, D)
    mask2d = src_mask.reshape(B, L).astype(jnp.float32)
    # TODO(synk): only the standard key-padding mask (B,1,1,L) is supported;
    # a general (B,1,Lq,Lk) mask would need an extra kernel input.

    kernel = functools.partial(_encoder_layer_kernel, batch=B, seq_len=L,
                               n_heads=n_heads, scale_inv=1.0 / math.sqrt(Dh),
                               eps=eps)
    operands = (x2d, mask2d,
                params["wqkv"], params["bqkv"], params["wo"], params["bo"],
                params["ln1_g"], params["ln1_b"],
                params["w1"], params["b1"], params["w2"], params["b2"],
                params["ln2_g"], params["ln2_b"])

    # Single grid point; every operand is small enough to live whole in VMEM.
    out2d = pl.pallas_call(
        kernel,
        out_shape=jax.ShapeDtypeStruct((B * L, D), jnp.float32),
        in_specs=[pl.BlockSpec(memory_space=pltpu.MemorySpace.VMEM)] * len(operands),
        out_specs=pl.BlockSpec(memory_space=pltpu.MemorySpace.VMEM),
    )(*operands)
    return out2d.reshape(B, L, D)


def encoder_layer_reference(params, src, src_mask, *, n_heads, eps=1e-5):
    """Pure-JAX reference mirroring the kernel math (for correctness check)."""
    B, L, D = src.shape
    H = n_heads
    Dh = D // H
    x = src.reshape(B * L, D)
    qkv = jnp.dot(x.astype(jnp.bfloat16), params["wqkv"],
                  preferred_element_type=jnp.float32) + params["bqkv"]
    q = qkv[:, :D].reshape(B, L, H, Dh).transpose(0, 2, 1, 3)
    k = qkv[:, D:2 * D].reshape(B, L, H, Dh).transpose(0, 2, 1, 3)
    v = qkv[:, 2 * D:].reshape(B, L, H, Dh).transpose(0, 2, 1, 3)
    e = jnp.einsum('bhqd,bhkd->bhqk', q.astype(jnp.bfloat16), k.astype(jnp.bfloat16),
                   preferred_element_type=jnp.float32) / math.sqrt(Dh)
    e = jnp.where(src_mask == 0, -1.0e10, e)
    p = jax.nn.softmax(e, axis=-1)
    ctx = jnp.einsum('bhqk,bhkd->bhqd', p.astype(jnp.bfloat16), v.astype(jnp.bfloat16),
                     preferred_element_type=jnp.float32)
    ctx = ctx.transpose(0, 2, 1, 3).reshape(B * L, D)
    attn = jnp.dot(ctx.astype(jnp.bfloat16), params["wo"],
                   preferred_element_type=jnp.float32) + params["bo"]

    def ln(t, g, b):
        mu = jnp.mean(t, axis=-1, keepdims=True)
        var = jnp.mean((t - mu) ** 2, axis=-1, keepdims=True)
        return (t - mu) * jax.lax.rsqrt(var + eps) * g + b

    h1 = ln(x + attn, params["ln1_g"], params["ln1_b"])
    f = jnp.dot(h1.astype(jnp.bfloat16), params["w1"],
                preferred_element_type=jnp.float32) + params["b1"]
    f = jnp.maximum(f, 0.0)
    f = jnp.dot(f.astype(jnp.bfloat16), params["w2"],
                preferred_element_type=jnp.float32) + params["b2"]
    y = ln(h1 + f, params["ln2_g"], params["ln2_b"])
    return y.reshape(B, L, D)


def init_params(key, *, hid_dim, pf_dim):
    def lin(k, din, dout):
        kw, kb = jax.random.split(k)
        w = (jax.random.normal(kw, (din, dout), jnp.float32) * 0.05).astype(jnp.bfloat16)
        b = jax.random.normal(kb, (1, dout), jnp.float32) * 0.01
        return w, b

    ks = jax.random.split(key, 4)
    wqkv, bqkv = lin(ks[0], hid_dim, 3 * hid_dim)   # fused fc_q|fc_k|fc_v
    wo, bo = lin(ks[1], hid_dim, hid_dim)           # fc_o
    w1, b1 = lin(ks[2], hid_dim, pf_dim)            # FFN fc1
    w2, b2 = lin(ks[3], pf_dim, hid_dim)            # FFN fc2
    return {
        "wqkv": wqkv, "bqkv": bqkv, "wo": wo, "bo": bo,
        "w1": w1, "b1": b1, "w2": w2, "b2": b2,
        "ln1_g": jnp.ones((1, hid_dim), jnp.float32),
        "ln1_b": jnp.zeros((1, hid_dim), jnp.float32),
        "ln2_g": jnp.ones((1, hid_dim), jnp.float32),
        "ln2_b": jnp.zeros((1, hid_dim), jnp.float32),
    }


if __name__ == "__main__":
    hid_dim = 32
    n_heads = 4
    pf_dim = 64
    B, L = 2, 8

    key = jax.random.PRNGKey(0)
    kp, kx = jax.random.split(key)
    params = init_params(kp, hid_dim=hid_dim, pf_dim=pf_dim)

    src = jax.random.normal(kx, (B, L, hid_dim), jnp.float32)
    # Standard key-padding mask (B, 1, 1, L); pad out the last 2 keys of batch 1.
    src_mask = jnp.ones((B, 1, 1, L), jnp.float32)
    src_mask = src_mask.at[1, :, :, L - 2:].set(0.0)

    fwd = jax.jit(functools.partial(encoder_layer_forward, n_heads=n_heads))
    out = fwd(params, src, src_mask)
    jax.block_until_ready(out)

    ref = encoder_layer_reference(params, src, src_mask, n_heads=n_heads)
    assert out.shape == (B, L, hid_dim)
    assert bool(jnp.all(jnp.isfinite(out)))
    assert bool(jnp.allclose(out, ref, atol=2e-2, rtol=2e-2)), \
        float(jnp.max(jnp.abs(out - ref)))
    print("KERNEL_OK")
</pallas_src>

<mosaic_0001>
module attributes {stable_mosaic.version = 11 : i64} {
  func.func @_encoder_layer_kernel(%arg0: memref<16x32xf32, #tpu.memory_space<vmem>>, %arg1: memref<2x8xf32, #tpu.memory_space<vmem>>, %arg2: memref<32x96xbf16, #tpu.memory_space<vmem>>, %arg3: memref<1x96xf32, #tpu.memory_space<vmem>>, %arg4: memref<32x32xbf16, #tpu.memory_space<vmem>>, %arg5: memref<1x32xf32, #tpu.memory_space<vmem>>, %arg6: memref<1x32xf32, #tpu.memory_space<vmem>>, %arg7: memref<1x32xf32, #tpu.memory_space<vmem>>, %arg8: memref<32x64xbf16, #tpu.memory_space<vmem>>, %arg9: memref<1x64xf32, #tpu.memory_space<vmem>>, %arg10: memref<64x32xbf16, #tpu.memory_space<vmem>>, %arg11: memref<1x32xf32, #tpu.memory_space<vmem>>, %arg12: memref<1x32xf32, #tpu.memory_space<vmem>>, %arg13: memref<1x32xf32, #tpu.memory_space<vmem>>, %arg14: memref<16x32xf32, #tpu.memory_space<vmem>>) attributes {dimension_semantics = [], scalar_prefetch = 0 : i64, scratch_operands = 0 : i64, tpu.core_type = #tpu.core_type<tc>} {
    %c0 = arith.constant 0 : index
    %c0_0 = arith.constant 0 : index
    %0 = vector.load %arg0[%c0, %c0_0] : memref<16x32xf32, #tpu.memory_space<vmem>>, vector<16x32xf32>
    %1 = arith.truncf %0 : vector<16x32xf32> to vector<16x32xbf16>
    %c0_1 = arith.constant 0 : index
    %c0_2 = arith.constant 0 : index
    %2 = vector.load %arg2[%c0_1, %c0_2] : memref<32x96xbf16, #tpu.memory_space<vmem>>, vector<32x96xbf16>
    %cst = arith.constant dense<0.000000e+00> : vector<16x96xf32>
    %3 = tpu.matmul %1, %2, %cst {dimension_numbers = #tpu.dot_dimension_numbers<[1], [0], [0], [1], [0, 0, 1, 1], [], []>} : vector<16x32xbf16>, vector<32x96xbf16>, vector<16x96xf32> -> vector<16x96xf32>
    %c0_3 = arith.constant 0 : index
    %c0_4 = arith.constant 0 : index
    %4 = vector.load %arg3[%c0_3, %c0_4] : memref<1x96xf32, #tpu.memory_space<vmem>>, vector<1x96xf32>
    %5 = vector.broadcast %4 : vector<1x96xf32> to vector<16x96xf32>
    %6 = arith.addf %3, %5 : vector<16x96xf32>
    %c0_5 = arith.constant 0 : index
    %c0_6 = arith.constant 0 : index
    %7 = vector.load %arg1[%c0_5, %c0_6] : memref<2x8xf32, #tpu.memory_space<vmem>>, vector<2x8xf32>
    %8 = vector.shape_cast %7 : vector<2x8xf32> to vector<2x1x8xf32>
    %cst_7 = arith.constant 0.000000e+00 : f32
    %9 = vector.broadcast %cst_7 : f32 to vector<2x1x8xf32>
    %10 = arith.cmpf oeq, %8, %9 : vector<2x1x8xf32>
    %c0_8 = arith.constant 0 : index
    %c0_9 = arith.constant 0 : index
    %11 = vector.load %arg4[%c0_8, %c0_9] : memref<32x32xbf16, #tpu.memory_space<vmem>>, vector<32x32xbf16>
    %cst_10 = arith.constant 0.000000e+00 : f32
    %12 = vector.broadcast %cst_10 : f32 to vector<16x32xf32>
    %13 = vector.extract_strided_slice %6 {offsets = [0, 0], sizes = [16, 8], strides = [1, 1]} : vector<16x96xf32> to vector<16x8xf32>
    %14 = vector.shape_cast %13 : vector<16x8xf32> to vector<2x8x8xf32>
    %15 = vector.extract_strided_slice %6 {offsets = [0, 32], sizes = [16, 8], strides = [1, 1]} : vector<16x96xf32> to vector<16x8xf32>
    %16 = vector.shape_cast %15 : vector<16x8xf32> to vector<2x8x8xf32>
    %17 = vector.extract_strided_slice %6 {offsets = [0, 64], sizes = [16, 8], strides = [1, 1]} : vector<16x96xf32> to vector<16x8xf32>
    %18 = vector.shape_cast %17 : vector<16x8xf32> to vector<2x8x8xf32>
    %19 = arith.truncf %14 : vector<2x8x8xf32> to vector<2x8x8xbf16>
    %20 = arith.truncf %16 : vector<2x8x8xf32> to vector<2x8x8xbf16>
    "tpu.trace_start"() <{level = 10 : i32, message = "bqd,bkd->bqk"}> : () -> ()
    %cst_11 = arith.constant dense<0.000000e+00> : vector<2x8x8xf32>
    %21 = tpu.matmul %19, %20, %cst_11 {dimension_numbers = #tpu.dot_dimension_numbers<[2], [2], [1], [1], [0, 0, 0, 1, 1, 1], [0], [0]>} : vector<2x8x8xbf16>, vector<2x8x8xbf16>, vector<2x8x8xf32> -> vector<2x8x8xf32>
    "tpu.trace_stop"() : () -> ()
    %cst_12 = arith.constant 0.353553385 : f32
    %22 = vector.broadcast %cst_12 : f32 to vector<2x8x8xf32>
    %23 = arith.mulf %21, %22 : vector<2x8x8xf32>
    %cst_13 = arith.constant -1.000000e+10 : f32
    %24 = vector.shape_cast %10 : vector<2x1x8xi1> to vector<2x1x8xi1>
    %25 = vector.broadcast %24 : vector<2x1x8xi1> to vector<2x8x8xi1>
    %26 = vector.broadcast %cst_13 : f32 to vector<2x8x8xf32>
    %27 = arith.select %25, %26, %23 : vector<2x8x8xi1>, vector<2x8x8xf32>
    %cst_14 = arith.constant dense<0xFF800000> : vector<2x8xf32>
    %28 = vector.multi_reduction <maximumf>, %27, %cst_14 [2] : vector<2x8x8xf32> to vector<2x8xf32>
    %29 = vector.shape_cast %28 : vector<2x8xf32> to vector<2x8x1xf32>
    %30 = vector.broadcast %29 : vector<2x8x1xf32> to vector<2x8x8xf32>
    %31 = arith.subf %27, %30 : vector<2x8x8xf32>
    %32 = math.exp %31 : vector<2x8x8xf32>
    %cst_15 = arith.constant dense<0.000000e+00> : vector<2x8xf32>
    %33 = vector.multi_reduction <add>, %32, %cst_15 [2] : vector<2x8x8xf32> to vector<2x8xf32>
    %34 = vector.shape_cast %33 : vector<2x8xf32> to vector<2x8x1xf32>
    %35 = tpu.reciprocal %34 {approx = true} : vector<2x8x1xf32> -> vector<2x8x1xf32>
    %36 = vector.broadcast %35 : vector<2x8x1xf32> to vector<2x8x8xf32>
    %37 = arith.mulf %32, %36 : vector<2x8x8xf32>
    %38 = arith.truncf %37 : vector<2x8x8xf32> to vector<2x8x8xbf16>
    %39 = arith.truncf %18 : vector<2x8x8xf32> to vector<2x8x8xbf16>
    "tpu.trace_start"() <{level = 10 : i32, message = "bqk,bkd->bqd"}> : () -> ()
    %cst_16 = arith.constant dense<0.000000e+00> : vector<2x8x8xf32>
    %40 = tpu.matmul %38, %39, %cst_16 {dimension_numbers = #tpu.dot_dimension_numbers<[2], [1], [1], [2], [0, 0, 0, 1, 1, 2], [0], [0]>} : vector<2x8x8xbf16>, vector<2x8x8xbf16>, vector<2x8x8xf32> -> vector<2x8x8xf32>
    "tpu.trace_stop"() : () -> ()
    %41 = vector.shape_cast %40 : vector<2x8x8xf32> to vector<16x8xf32>
    %42 = arith.truncf %41 : vector<16x8xf32> to vector<16x8xbf16>
    %43 = vector.extract_strided_slice %11 {offsets = [0, 0], sizes = [8, 32], strides = [1, 1]} : vector<32x32xbf16> to vector<8x32xbf16>
    %cst_17 = arith.constant dense<0.000000e+00> : vector<16x32xf32>
    %44 = tpu.matmul %42, %43, %cst_17 {dimension_numbers = #tpu.dot_dimension_numbers<[1], [0], [0], [1], [0, 0, 1, 1], [], []>} : vector<16x8xbf16>, vector<8x32xbf16>, vector<16x32xf32> -> vector<16x32xf32>
    %45 = arith.addf %12, %44 : vector<16x32xf32>
    %46 = vector.extract_strided_slice %6 {offsets = [0, 8], sizes = [16, 8], strides = [1, 1]} : vector<16x96xf32> to vector<16x8xf32>
    %47 = vector.shape_cast %46 : vector<16x8xf32> to vector<2x8x8xf32>
    %48 = vector.extract_strided_slice %6 {offsets = [0, 40], sizes = [16, 8], strides = [1, 1]} : vector<16x96xf32> to vector<16x8xf32>
    %49 = vector.shape_cast %48 : vector<16x8xf32> to vector<2x8x8xf32>
    %50 = vector.extract_strided_slice %6 {offsets = [0, 72], sizes = [16, 8], strides = [1, 1]} : vector<16x96xf32> to vector<16x8xf32>
    %51 = vector.shape_cast %50 : vector<16x8xf32> to vector<2x8x8xf32>
    %52 = arith.truncf %47 : vector<2x8x8xf32> to vector<2x8x8xbf16>
    %53 = arith.truncf %49 : vector<2x8x8xf32> to vector<2x8x8xbf16>
    "tpu.trace_start"() <{level = 10 : i32, message = "bqd,bkd->bqk"}> : () -> ()
    %cst_18 = arith.constant dense<0.000000e+00> : vector<2x8x8xf32>
    %54 = tpu.matmul %52, %53, %cst_18 {dimension_numbers = #tpu.dot_dimension_numbers<[2], [2], [1], [1], [0, 0, 0, 1, 1, 1], [0], [0]>} : vector<2x8x8xbf16>, vector<2x8x8xbf16>, vector<2x8x8xf32> -> vector<2x8x8xf32>
    "tpu.trace_stop"() : () -> ()
    %cst_19 = arith.constant 0.353553385 : f32
    %55 = vector.broadcast %cst_19 : f32 to vector<2x8x8xf32>
    %56 = arith.mulf %54, %55 : vector<2x8x8xf32>
    %cst_20 = arith.constant -1.000000e+10 : f32
    %57 = vector.shape_cast %10 : vector<2x1x8xi1> to vector<2x1x8xi1>
    %58 = vector.broadcast %57 : vector<2x1x8xi1> to vector<2x8x8xi1>
    %59 = vector.broadcast %cst_20 : f32 to vector<2x8x8xf32>
    %60 = arith.select %58, %59, %56 : vector<2x8x8xi1>, vector<2x8x8xf32>
    %cst_21 = arith.constant dense<0xFF800000> : vector<2x8xf32>
    %61 = vector.multi_reduction <maximumf>, %60, %cst_21 [2] : vector<2x8x8xf32> to vector<2x8xf32>
    %62 = vector.shape_cast %61 : vector<2x8xf32> to vector<2x8x1xf32>
    %63 = vector.broadcast %62 : vector<2x8x1xf32> to vector<2x8x8xf32>
    %64 = arith.subf %60, %63 : vector<2x8x8xf32>
    %65 = math.exp %64 : vector<2x8x8xf32>
    %cst_22 = arith.constant dense<0.000000e+00> : vector<2x8xf32>
    %66 = vector.multi_reduction <add>, %65, %cst_22 [2] : vector<2x8x8xf32> to vector<2x8xf32>
    %67 = vector.shape_cast %66 : vector<2x8xf32> to vector<2x8x1xf32>
    %68 = tpu.reciprocal %67 {approx = true} : vector<2x8x1xf32> -> vector<2x8x1xf32>
    %69 = vector.broadcast %68 : vector<2x8x1xf32> to vector<2x8x8xf32>
    %70 = arith.mulf %65, %69 : vector<2x8x8xf32>
    %71 = arith.truncf %70 : vector<2x8x8xf32> to vector<2x8x8xbf16>
    %72 = arith.truncf %51 : vector<2x8x8xf32> to vector<2x8x8xbf16>
    "tpu.trace_start"() <{level = 10 : i32, message = "bqk,bkd->bqd"}> : () -> ()
    %cst_23 = arith.constant dense<0.000000e+00> : vector<2x8x8xf32>
    %73 = tpu.matmul %71, %72, %cst_23 {dimension_numbers = #tpu.dot_dimension_numbers<[2], [1], [1], [2], [0, 0, 0, 1, 1, 2], [0], [0]>} : vector<2x8x8xbf16>, vector<2x8x8xbf16>, vector<2x8x8xf32> -> vector<2x8x8xf32>
    "tpu.trace_stop"() : () -> ()
    %74 = vector.shape_cast %73 : vector<2x8x8xf32> to vector<16x8xf32>
    %75 = arith.truncf %74 : vector<16x8xf32> to vector<16x8xbf16>
    %76 = vector.extract_strided_slice %11 {offsets = [8, 0], sizes = [8, 32], strides = [1, 1]} : vector<32x32xbf16> to vector<8x32xbf16>
    %cst_24 = arith.constant dense<0.000000e+00> : vector<16x32xf32>
    %77 = tpu.matmul %75, %76, %cst_24 {dimension_numbers = #tpu.dot_dimension_numbers<[1], [0], [0], [1], [0, 0, 1, 1], [], []>} : vector<16x8xbf16>, vector<8x32xbf16>, vector<16x32xf32> -> vector<16x32xf32>
    %78 = arith.addf %45, %77 : vector<16x32xf32>
    %79 = vector.extract_strided_slice %6 {offsets = [0, 16], sizes = [16, 8], strides = [1, 1]} : vector<16x96xf32> to vector<16x8xf32>
    %80 = vector.shape_cast %79 : vector<16x8xf32> to vector<2x8x8xf32>
    %81 = vector.extract_strided_slice %6 {offsets = [0, 48], sizes = [16, 8], strides = [1, 1]} : vector<16x96xf32> to vector<16x8xf32>
    %82 = vector.shape_cast %81 : vector<16x8xf32> to vector<2x8x8xf32>
    %83 = vector.extract_strided_slice %6 {offsets = [0, 80], sizes = [16, 8], strides = [1, 1]} : vector<16x96xf32> to vector<16x8xf32>
    %84 = vector.shape_cast %83 : vector<16x8xf32> to vector<2x8x8xf32>
    %85 = arith.truncf %80 : vector<2x8x8xf32> to vector<2x8x8xbf16>
    %86 = arith.truncf %82 : vector<2x8x8xf32> to vector<2x8x8xbf16>
    "tpu.trace_start"() <{level = 10 : i32, message = "bqd,bkd->bqk"}> : () -> ()
    %cst_25 = arith.constant dense<0.000000e+00> : vector<2x8x8xf32>
    %87 = tpu.matmul %85, %86, %cst_25 {dimension_numbers = #tpu.dot_dimension_numbers<[2], [2], [1], [1], [0, 0, 0, 1, 1, 1], [0], [0]>} : vector<2x8x8xbf16>, vector<2x8x8xbf16>, vector<2x8x8xf32> -> vector<2x8x8xf32>
    "tpu.trace_stop"() : () -> ()
    %cst_26 = arith.constant 0.353553385 : f32
    %88 = vector.broadcast %cst_26 : f32 to vector<2x8x8xf32>
    %89 = arith.mulf %87, %88 : vector<2x8x8xf32>
    %cst_27 = arith.constant -1.000000e+10 : f32
    %90 = vector.shape_cast %10 : vector<2x1x8xi1> to vector<2x1x8xi1>
    %91 = vector.broadcast %90 : vector<2x1x8xi1> to vector<2x8x8xi1>
    %92 = vector.broadcast %cst_27 : f32 to vector<2x8x8xf32>
    %93 = arith.select %91, %92, %89 : vector<2x8x8xi1>, vector<2x8x8xf32>
    %cst_28 = arith.constant dense<0xFF800000> : vector<2x8xf32>
    %94 = vector.multi_reduction <maximumf>, %93, %cst_28 [2] : vector<2x8x8xf32> to vector<2x8xf32>
    %95 = vector.shape_cast %94 : vector<2x8xf32> to vector<2x8x1xf32>
    %96 = vector.broadcast %95 : vector<2x8x1xf32> to vector<2x8x8xf32>
    %97 = arith.subf %93, %96 : vector<2x8x8xf32>
    %98 = math.exp %97 : vector<2x8x8xf32>
    %cst_29 = arith.constant dense<0.000000e+00> : vector<2x8xf32>
    %99 = vector.multi_reduction <add>, %98, %cst_29 [2] : vector<2x8x8xf32> to vector<2x8xf32>
    %100 = vector.shape_cast %99 : vector<2x8xf32> to vector<2x8x1xf32>
    %101 = tpu.reciprocal %100 {approx = true} : vector<2x8x1xf32> -> vector<2x8x1xf32>
    %102 = vector.broadcast %101 : vector<2x8x1xf32> to vector<2x8x8xf32>
    %103 = arith.mulf %98, %102 : vector<2x8x8xf32>
    %104 = arith.truncf %103 : vector<2x8x8xf32> to vector<2x8x8xbf16>
    %105 = arith.truncf %84 : vector<2x8x8xf32> to vector<2x8x8xbf16>
    "tpu.trace_start"() <{level = 10 : i32, message = "bqk,bkd->bqd"}> : () -> ()
    %cst_30 = arith.constant dense<0.000000e+00> : vector<2x8x8xf32>
    %106 = tpu.matmul %104, %105, %cst_30 {dimension_numbers = #tpu.dot_dimension_numbers<[2], [1], [1], [2], [0, 0, 0, 1, 1, 2], [0], [0]>} : vector<2x8x8xbf16>, vector<2x8x8xbf16>, vector<2x8x8xf32> -> vector<2x8x8xf32>
    "tpu.trace_stop"() : () -> ()
    %107 = vector.shape_cast %106 : vector<2x8x8xf32> to vector<16x8xf32>
    %108 = arith.truncf %107 : vector<16x8xf32> to vector<16x8xbf16>
    %109 = vector.extract_strided_slice %11 {offsets = [16, 0], sizes = [8, 32], strides = [1, 1]} : vector<32x32xbf16> to vector<8x32xbf16>
    %cst_31 = arith.constant dense<0.000000e+00> : vector<16x32xf32>
    %110 = tpu.matmul %108, %109, %cst_31 {dimension_numbers = #tpu.dot_dimension_numbers<[1], [0], [0], [1], [0, 0, 1, 1], [], []>} : vector<16x8xbf16>, vector<8x32xbf16>, vector<16x32xf32> -> vector<16x32xf32>
    %111 = arith.addf %78, %110 : vector<16x32xf32>
    %112 = vector.extract_strided_slice %6 {offsets = [0, 24], sizes = [16, 8], strides = [1, 1]} : vector<16x96xf32> to vector<16x8xf32>
    %113 = vector.shape_cast %112 : vector<16x8xf32> to vector<2x8x8xf32>
    %114 = vector.extract_strided_slice %6 {offsets = [0, 56], sizes = [16, 8], strides = [1, 1]} : vector<16x96xf32> to vector<16x8xf32>
    %115 = vector.shape_cast %114 : vector<16x8xf32> to vector<2x8x8xf32>
    %116 = vector.extract_strided_slice %6 {offsets = [0, 88], sizes = [16, 8], strides = [1, 1]} : vector<16x96xf32> to vector<16x8xf32>
    %117 = vector.shape_cast %116 : vector<16x8xf32> to vector<2x8x8xf32>
    %118 = arith.truncf %113 : vector<2x8x8xf32> to vector<2x8x8xbf16>
    %119 = arith.truncf %115 : vector<2x8x8xf32> to vector<2x8x8xbf16>
    "tpu.trace_start"() <{level = 10 : i32, message = "bqd,bkd->bqk"}> : () -> ()
    %cst_32 = arith.constant dense<0.000000e+00> : vector<2x8x8xf32>
    %120 = tpu.matmul %118, %119, %cst_32 {dimension_numbers = #tpu.dot_dimension_numbers<[2], [2], [1], [1], [0, 0, 0, 1, 1, 1], [0], [0]>} : vector<2x8x8xbf16>, vector<2x8x8xbf16>, vector<2x8x8xf32> -> vector<2x8x8xf32>
    "tpu.trace_stop"() : () -> ()
    %cst_33 = arith.constant 0.353553385 : f32
    %121 = vector.broadcast %cst_33 : f32 to vector<2x8x8xf32>
    %122 = arith.mulf %120, %121 : vector<2x8x8xf32>
    %cst_34 = arith.constant -1.000000e+10 : f32
    %123 = vector.shape_cast %10 : vector<2x1x8xi1> to vector<2x1x8xi1>
    %124 = vector.broadcast %123 : vector<2x1x8xi1> to vector<2x8x8xi1>
    %125 = vector.broadcast %cst_34 : f32 to vector<2x8x8xf32>
    %126 = arith.select %124, %125, %122 : vector<2x8x8xi1>, vector<2x8x8xf32>
    %cst_35 = arith.constant dense<0xFF800000> : vector<2x8xf32>
    %127 = vector.multi_reduction <maximumf>, %126, %cst_35 [2] : vector<2x8x8xf32> to vector<2x8xf32>
    %128 = vector.shape_cast %127 : vector<2x8xf32> to vector<2x8x1xf32>
    %129 = vector.broadcast %128 : vector<2x8x1xf32> to vector<2x8x8xf32>
    %130 = arith.subf %126, %129 : vector<2x8x8xf32>
    %131 = math.exp %130 : vector<2x8x8xf32>
    %cst_36 = arith.constant dense<0.000000e+00> : vector<2x8xf32>
    %132 = vector.multi_reduction <add>, %131, %cst_36 [2] : vector<2x8x8xf32> to vector<2x8xf32>
    %133 = vector.shape_cast %132 : vector<2x8xf32> to vector<2x8x1xf32>
    %134 = tpu.reciprocal %133 {approx = true} : vector<2x8x1xf32> -> vector<2x8x1xf32>
    %135 = vector.broadcast %134 : vector<2x8x1xf32> to vector<2x8x8xf32>
    %136 = arith.mulf %131, %135 : vector<2x8x8xf32>
    %137 = arith.truncf %136 : vector<2x8x8xf32> to vector<2x8x8xbf16>
    %138 = arith.truncf %117 : vector<2x8x8xf32> to vector<2x8x8xbf16>
    "tpu.trace_start"() <{level = 10 : i32, message = "bqk,bkd->bqd"}> : () -> ()
    %cst_37 = arith.constant dense<0.000000e+00> : vector<2x8x8xf32>
    %139 = tpu.matmul %137, %138, %cst_37 {dimension_numbers = #tpu.dot_dimension_numbers<[2], [1], [1], [2], [0, 0, 0, 1, 1, 2], [0], [0]>} : vector<2x8x8xbf16>, vector<2x8x8xbf16>, vector<2x8x8xf32> -> vector<2x8x8xf32>
    "tpu.trace_stop"() : () -> ()
    %140 = vector.shape_cast %139 : vector<2x8x8xf32> to vector<16x8xf32>
    %141 = arith.truncf %140 : vector<16x8xf32> to vector<16x8xbf16>
    %142 = vector.extract_strided_slice %11 {offsets = [24, 0], sizes = [8, 32], strides = [1, 1]} : vector<32x32xbf16> to vector<8x32xbf16>
    %cst_38 = arith.constant dense<0.000000e+00> : vector<16x32xf32>
    %143 = tpu.matmul %141, %142, %cst_38 {dimension_numbers = #tpu.dot_dimension_numbers<[1], [0], [0], [1], [0, 0, 1, 1], [], []>} : vector<16x8xbf16>, vector<8x32xbf16>, vector<16x32xf32> -> vector<16x32xf32>
    %144 = arith.addf %111, %143 : vector<16x32xf32>
    %c0_39 = arith.constant 0 : index
    %c0_40 = arith.constant 0 : index
    %145 = vector.load %arg5[%c0_39, %c0_40] : memref<1x32xf32, #tpu.memory_space<vmem>>, vector<1x32xf32>
    %146 = vector.broadcast %145 : vector<1x32xf32> to vector<16x32xf32>
    %147 = arith.addf %144, %146 : vector<16x32xf32>
    %148 = arith.addf %0, %147 : vector<16x32xf32>
    %cst_41 = arith.constant dense<0.000000e+00> : vector<16xf32>
    %149 = vector.multi_reduction <add>, %148, %cst_41 [1] : vector<16x32xf32> to vector<16xf32>
    %150 = vector.shape_cast %149 : vector<16xf32> to vector<16x1xf32>
    %cst_42 = arith.constant 3.200000e+01 : f32
    %151 = vector.broadcast %cst_42 : f32 to vector<16x1xf32>
    %152 = arith.divf %150, %151 : vector<16x1xf32>
    %153 = vector.broadcast %152 : vector<16x1xf32> to vector<16x32xf32>
    %154 = arith.subf %148, %153 : vector<16x32xf32>
    %155 = arith.mulf %154, %154 : vector<16x32xf32>
    %cst_43 = arith.constant dense<0.000000e+00> : vector<16xf32>
    %156 = vector.multi_reduction <add>, %155, %cst_43 [1] : vector<16x32xf32> to vector<16xf32>
    %157 = vector.shape_cast %156 : vector<16xf32> to vector<16x1xf32>
    %cst_44 = arith.constant 3.200000e+01 : f32
    %158 = vector.broadcast %cst_44 : f32 to vector<16x1xf32>
    %159 = arith.divf %157, %158 : vector<16x1xf32>
    %160 = vector.broadcast %152 : vector<16x1xf32> to vector<16x32xf32>
    %161 = arith.subf %148, %160 : vector<16x32xf32>
    %cst_45 = arith.constant 9.99999974E-6 : f32
    %162 = vector.broadcast %cst_45 : f32 to vector<16x1xf32>
    %163 = arith.addf %159, %162 : vector<16x1xf32>
    %164 = math.rsqrt %163 : vector<16x1xf32>
    %165 = vector.broadcast %164 : vector<16x1xf32> to vector<16x32xf32>
    %166 = arith.mulf %161, %165 : vector<16x32xf32>
    %c0_46 = arith.constant 0 : index
    %c0_47 = arith.constant 0 : index
    %167 = vector.load %arg6[%c0_46, %c0_47] : memref<1x32xf32, #tpu.memory_space<vmem>>, vector<1x32xf32>
    %168 = vector.broadcast %167 : vector<1x32xf32> to vector<16x32xf32>
    %169 = arith.mulf %166, %168 : vector<16x32xf32>
    %c0_48 = arith.constant 0 : index
    %c0_49 = arith.constant 0 : index
    %170 = vector.load %arg7[%c0_48, %c0_49] : memref<1x32xf32, #tpu.memory_space<vmem>>, vector<1x32xf32>
    %171 = vector.broadcast %170 : vector<1x32xf32> to vector<16x32xf32>
    %172 = arith.addf %169, %171 : vector<16x32xf32>
    %173 = arith.truncf %172 : vector<16x32xf32> to vector<16x32xbf16>
    %c0_50 = arith.constant 0 : index
    %c0_51 = arith.constant 0 : index
    %174 = vector.load %arg8[%c0_50, %c0_51] : memref<32x64xbf16, #tpu.memory_space<vmem>>, vector<32x64xbf16>
    %cst_52 = arith.constant dense<0.000000e+00> : vector<16x64xf32>
    %175 = tpu.matmul %173, %174, %cst_52 {dimension_numbers = #tpu.dot_dimension_numbers<[1], [0], [0], [1], [0, 0, 1, 1], [], []>} : vector<16x32xbf16>, vector<32x64xbf16>, vector<16x64xf32> -> vector<16x64xf32>
    %c0_53 = arith.constant 0 : index
    %c0_54 = arith.constant 0 : index
    %176 = vector.load %arg9[%c0_53, %c0_54] : memref<1x64xf32, #tpu.memory_space<vmem>>, vector<1x64xf32>
    %177 = vector.broadcast %176 : vector<1x64xf32> to vector<16x64xf32>
    %178 = arith.addf %175, %177 : vector<16x64xf32>
    %cst_55 = arith.constant 0.000000e+00 : f32
    %179 = vector.broadcast %cst_55 : f32 to vector<16x64xf32>
    %180 = arith.maximumf %178, %179 : vector<16x64xf32>
    %181 = arith.truncf %180 : vector<16x64xf32> to vector<16x64xbf16>
    %c0_56 = arith.constant 0 : index
    %c0_57 = arith.constant 0 : index
    %182 = vector.load %arg10[%c0_56, %c0_57] : memref<64x32xbf16, #tpu.memory_space<vmem>>, vector<64x32xbf16>
    %cst_58 = arith.constant dense<0.000000e+00> : vector<16x32xf32>
    %183 = tpu.matmul %181, %182, %cst_58 {dimension_numbers = #tpu.dot_dimension_numbers<[1], [0], [0], [1], [0, 0, 1, 1], [], []>} : vector<16x64xbf16>, vector<64x32xbf16>, vector<16x32xf32> -> vector<16x32xf32>
    %c0_59 = arith.constant 0 : index
    %c0_60 = arith.constant 0 : index
    %184 = vector.load %arg11[%c0_59, %c0_60] : memref<1x32xf32, #tpu.memory_space<vmem>>, vector<1x32xf32>
    %185 = vector.broadcast %184 : vector<1x32xf32> to vector<16x32xf32>
    %186 = arith.addf %183, %185 : vector<16x32xf32>
    %187 = arith.addf %172, %186 : vector<16x32xf32>
    %cst_61 = arith.constant dense<0.000000e+00> : vector<16xf32>
    %188 = vector.multi_reduction <add>, %187, %cst_61 [1] : vector<16x32xf32> to vector<16xf32>
    %189 = vector.shape_cast %188 : vector<16xf32> to vector<16x1xf32>
    %cst_62 = arith.constant 3.200000e+01 : f32
    %190 = vector.broadcast %cst_62 : f32 to vector<16x1xf32>
    %191 = arith.divf %189, %190 : vector<16x1xf32>
    %192 = vector.broadcast %191 : vector<16x1xf32> to vector<16x32xf32>
    %193 = arith.subf %187, %192 : vector<16x32xf32>
    %194 = arith.mulf %193, %193 : vector<16x32xf32>
    %cst_63 = arith.constant dense<0.000000e+00> : vector<16xf32>
    %195 = vector.multi_reduction <add>, %194, %cst_63 [1] : vector<16x32xf32> to vector<16xf32>
    %196 = vector.shape_cast %195 : vector<16xf32> to vector<16x1xf32>
    %cst_64 = arith.constant 3.200000e+01 : f32
    %197 = vector.broadcast %cst_64 : f32 to vector<16x1xf32>
    %198 = arith.divf %196, %197 : vector<16x1xf32>
    %199 = vector.broadcast %191 : vector<16x1xf32> to vector<16x32xf32>
    %200 = arith.subf %187, %199 : vector<16x32xf32>
    %cst_65 = arith.constant 9.99999974E-6 : f32
    %201 = vector.broadcast %cst_65 : f32 to vector<16x1xf32>
    %202 = arith.addf %198, %201 : vector<16x1xf32>
    %203 = math.rsqrt %202 : vector<16x1xf32>
    %204 = vector.broadcast %203 : vector<16x1xf32> to vector<16x32xf32>
    %205 = arith.mulf %200, %204 : vector<16x32xf32>
    %c0_66 = arith.constant 0 : index
    %c0_67 = arith.constant 0 : index
    %206 = vector.load %arg12[%c0_66, %c0_67] : memref<1x32xf32, #tpu.memory_space<vmem>>, vector<1x32xf32>
    %207 = vector.broadcast %206 : vector<1x32xf32> to vector<16x32xf32>
    %208 = arith.mulf %205, %207 : vector<16x32xf32>
    %c0_68 = arith.constant 0 : index
    %c0_69 = arith.constant 0 : index
    %209 = vector.load %arg13[%c0_68, %c0_69] : memref<1x32xf32, #tpu.memory_space<vmem>>, vector<1x32xf32>
    %210 = vector.broadcast %209 : vector<1x32xf32> to vector<16x32xf32>
    %211 = arith.addf %208, %210 : vector<16x32xf32>
    %c0_70 = arith.constant 0 : index
    %c0_71 = arith.constant 0 : index
    %212 = vector.load %arg14[%c0_70, %c0_71] : memref<16x32xf32, #tpu.memory_space<vmem>>, vector<16x32xf32>
    tpu.vector_store %arg14[%c0_70, %c0_71], %211 {strides = array<i32>} : memref<16x32xf32, #tpu.memory_space<vmem>>, vector<16x32xf32>,
    return
  }
}

</mosaic_0001>

<bundles_post_ra>
// kernel: encoder_layer_forward.1
= control target key start
LH: loop header
LB: loop body
LE: loop exit
PB: predicated region body
PF: predicated region fallthrough
CT: control target
= control target key end

     0   :  { %19 = vsyncpa [#allocation3], 0  ;;  %s2630_s0 = inlined_call_operand.vmem [shape: f32[16,32], index: 0, kind: input, shape index: {}]   ;;  %s2631_s1 = inlined_call_operand.vmem [shape: f32[2,8], index: 1, kind: input, shape index: {}]   ;;  %s2632_s2 = inlined_call_operand.vmem [shape: bf16[32,96], index: 2, kind: input, shape index: {}]   ;;  %s2633_s3 = inlined_call_operand.hbm [shape: f32[1,96], index: 3, kind: input, shape index: {}]   ;;  %s2634_s4 = inlined_call_operand.vmem [shape: bf16[32,32], index: 4, kind: input, shape index: {}]   ;;  %s2635_s5 = inlined_call_operand.hbm [shape: f32[1,32], index: 5, kind: input, shape index: {}]   ;;  %s2636_s6 = inlined_call_operand.hbm [shape: f32[1,32], index: 6, kind: input, shape index: {}]   ;;  %s2637_s7 = inlined_call_operand.hbm [shape: f32[1,32], index: 7, kind: input, shape index: {}]   ;;  %s2638_s8 = inlined_call_operand.vmem [shape: bf16[32,64], index: 8, kind: input, shape index: {}]   ;;  %s2639_s9 = inlined_call_operand.hbm [shape: f32[1,64], index: 9, kind: input, shape index: {}]   ;;  %s2640_s10 = inlined_call_operand.vmem [shape: bf16[64,32], index: 10, kind: input, shape index: {}]   ;;  %s2641_s11 = inlined_call_operand.hbm [shape: f32[1,32], index: 11, kind: input, shape index: {}]   ;;  %s2642_s12 = inlined_call_operand.hbm [shape: f32[1,32], index: 12, kind: input, shape index: {}]   ;;  %s2643_s13 = inlined_call_operand.hbm [shape: f32[1,32], index: 13, kind: input, shape index: {}]   ;;  %s2644_s14 = inlined_call_operand.hbm [shape: f32[16,32], index: 14, kind: output, shape index: {}]  }
   0x1   :  { %20 = vsyncpa [#allocation6], 0 }
   0x2   :  { %21 = vsyncpa [#allocation9], 0 }
   0x3   :  { %22 = vsyncpa [#allocation12], 0 }
   0x4   :  { %23 = vsyncpa [#allocation15], 0 }
   0x5   :  { %24 = vsyncpa [#allocation4], 0  ;;  %s2154_s29 = smov [#allocation5]   ;;  %s2155_s15 = smov [#allocation8]  }
   0x6   :  { %s49_s30 = sshll.u32 %s2154_s29, 4  ;;  %s69_s16 = sshll.u32 %s2155_s15, 4  ;;  %s50_s30 = int_to_ptr.vmem [resolvable:$true] %s49_s30  ;;  %s70_s16 = int_to_ptr.vmem [resolvable:$true] %s69_s16 }
   0x7   :  { %s1944_s19 = scalar_lea.hbm %s2635_s5, 16 }
   0x8   :  { %p1945_p0 = scmp.ne.s32.totalorder %s2635_s5, %s1944_s19  ;;  %p1948_p1 = scmp.lt.u32.totalorder %s1944_s19, %s2635_s5 }
   0xa   :  { %p1950_p2 = pnand %p1948_p1, %p1945_p0 }
   0xc   :  { %1953 = shalt.err (!%p1950_p2)
}
   0xd   :  { %s1954_s24 = scalar_lea.vmem %s50_s30, 16  ;;  %s1958_s25 = scalar_lea.vmem %s50_s30, 32 }
   0xe   :  { %p1955_p3 = scmp.ne.s32.totalorder %s50_s30, %s1954_s24  ;;  %p1959_p4 = scmp.lt.s32.totalorder %s50_s30, %s50_s30 }
   0xf   :  { %p1960_p5 = scmp.lt.s32.totalorder %s1958_s25, %s1954_s24 }
  0x11   :  { %p1961_p6 = por %p1960_p5, %p1959_p4 }
  0x13   :  { %p1962_p7 = pnand %p1961_p6, %p1955_p3 }
  0x15   :  { %1965 = shalt.err (!%p1962_p7)
}
  0x16   :  { %52 = dma.hbm_to_vmem [thread:$0]  %s2635_s5, 16, %s50_s30, [#allocation6]  }
  0x17   :  { %s1966_s15 = scalar_lea.hbm %s2637_s7, 16 }
  0x18   :  { %p1967_p8 = scmp.ne.s32.totalorder %s2637_s7, %s1966_s15  ;;  %p1970_p9 = scmp.lt.u32.totalorder %s1966_s15, %s2637_s7 }
  0x1a   :  { %p1972_p10 = pnand %p1970_p9, %p1967_p8 }
  0x1c   :  { %1975 = shalt.err (!%p1972_p10)
}
  0x1d   :  { %s1976_s21 = scalar_lea.vmem %s70_s16, 16  ;;  %s1980_s22 = scalar_lea.vmem %s70_s16, 32 }
  0x1e   :  { %p1977_p11 = scmp.ne.s32.totalorder %s70_s16, %s1976_s21  ;;  %p1981_p12 = scmp.lt.s32.totalorder %s70_s16, %s70_s16 }
  0x1f   :  { %p1982_p13 = scmp.lt.s32.totalorder %s1980_s22, %s1976_s21 }
  0x21   :  { %p1983_p0 = por %p1982_p13, %p1981_p12 }
  0x23   :  { %p1984_p1 = pnand %p1983_p0, %p1977_p11 }
  0x25   :  { %1987 = shalt.err (!%p1984_p1)
}
  0x26   :  { %72 = dma.hbm_to_vmem [thread:$0]  %s2637_s7, 16, %s70_s16, [#allocation9]  }
  0x27   :  { %s2156_s23 = smov [#allocation11]   ;;  %s2157_s25 = smov [#allocation2]  }
  0x28   :  { %s93_s24 = sshll.u32 %s2156_s23, 4  ;;  %s37_s26 = sshll.u32 %s2157_s25, 4  ;;  %s94_s24 = int_to_ptr.vmem [resolvable:$true] %s93_s24  ;;  %s38_s26 = int_to_ptr.vmem [resolvable:$true] %s37_s26 }
  0x29   :  { %s1988_s29 = scalar_lea.hbm %s2641_s11, 16 }
  0x2a   :  { %p1989_p2 = scmp.ne.s32.totalorder %s2641_s11, %s1988_s29  ;;  %p1992_p3 = scmp.lt.u32.totalorder %s1988_s29, %s2641_s11 }
  0x2c   :  { %p1994_p4 = pnand %p1992_p3, %p1989_p2 }
  0x2e   :  { %1997 = shalt.err (!%p1994_p4)
}
  0x2f   :  { %s1998_s7 = scalar_lea.vmem %s94_s24, 16  ;;  %s2002_s16 = scalar_lea.vmem %s94_s24, 32 }
  0x30   :  { %p1999_p5 = scmp.ne.s32.totalorder %s94_s24, %s1998_s7  ;;  %p2003_p6 = scmp.lt.s32.totalorder %s94_s24, %s94_s24 }
  0x31   :  { %p2004_p7 = scmp.lt.s32.totalorder %s2002_s16, %s1998_s7 }
  0x33   :  { %p2005_p8 = por %p2004_p7, %p2003_p6 }
  0x35   :  { %p2006_p9 = pnand %p2005_p8, %p1999_p5 }
  0x37   :  { %2009 = shalt.err (!%p2006_p9)
}
  0x38   :  { %96 = dma.hbm_to_vmem [thread:$0]  %s2641_s11, 16, %s94_s24, [#allocation12]  }
  0x39   :  { %s2010_s30 = scalar_lea.hbm %s2633_s3, 16 }
  0x3a   :  { %p2011_p10 = scmp.ne.s32.totalorder %s2633_s3, %s2010_s30  ;;  %p2014_p11 = scmp.lt.u32.totalorder %s2010_s30, %s2633_s3 }
  0x3c   :  { %p2016_p12 = pnand %p2014_p11, %p2011_p10 }
  0x3e   :  { %2019 = shalt.err (!%p2016_p12)
}
  0x3f   :  { %s2020_s29 = scalar_lea.vmem %s38_s26, 16  ;;  %s2024_s15 = scalar_lea.vmem %s38_s26, 32 }
  0x40   :  { %p2021_p13 = scmp.ne.s32.totalorder %s38_s26, %s2020_s29  ;;  %p2025_p0 = scmp.lt.s32.totalorder %s38_s26, %s38_s26 }
  0x41   :  { %p2026_p1 = scmp.lt.s32.totalorder %s2024_s15, %s2020_s29 }
  0x43   :  { %p2027_p2 = por %p2026_p1, %p2025_p0 }
  0x45   :  { %p2028_p3 = pnand %p2027_p2, %p2021_p13 }
  0x47   :  { %2031 = shalt.err (!%p2028_p3)
}
  0x48   :  { %40 = dma.hbm_to_vmem [thread:$0]  %s2633_s3, 16, %s38_s26, [#allocation3]  }
  0x49   :  { %s2158_s17 = smov [#allocation7]   ;;  %s2159_s19 = smov [#allocation10]  }
  0x4a   :  { %s59_s18 = sshll.u32 %s2158_s17, 4  ;;  %s81_s7 = sshll.u32 %s2159_s19, 4  ;;  %s60_s18 = int_to_ptr.vmem [resolvable:$true] %s59_s18  ;;  %s82_s7 = int_to_ptr.vmem [resolvable:$true] %s81_s7 }
  0x4b   :  { %s2032_s21 = scalar_lea.hbm %s2636_s6, 16 }
  0x4c   :  { %p2033_p4 = scmp.ne.s32.totalorder %s2636_s6, %s2032_s21  ;;  %p2036_p5 = scmp.lt.u32.totalorder %s2032_s21, %s2636_s6 }
  0x4e   :  { %p2038_p6 = pnand %p2036_p5, %p2033_p4 }
  0x50   :  { %2041 = shalt.err (!%p2038_p6)
}
  0x51   :  { %s2042_s3 = scalar_lea.vmem %s60_s18, 16  ;;  %s2046_s26 = scalar_lea.vmem %s60_s18, 32 }
  0x52   :  { %p2043_p7 = scmp.ne.s32.totalorder %s60_s18, %s2042_s3  ;;  %p2047_p8 = scmp.lt.s32.totalorder %s60_s18, %s60_s18 }
  0x53   :  { %p2048_p9 = scmp.lt.s32.totalorder %s2046_s26, %s2042_s3 }
  0x55   :  { %p2049_p10 = por %p2048_p9, %p2047_p8 }
  0x57   :  { %p2050_p11 = pnand %p2049_p10, %p2043_p7 }
  0x59   :  { %2053 = shalt.err (!%p2050_p11)
}
  0x5a   :  { %62 = dma.hbm_to_vmem [thread:$0]  %s2636_s6, 16, %s60_s18, [#allocation6]  }
  0x5b   :  { %s2054_s15 = scalar_lea.hbm %s2639_s9, 16 }
  0x5c   :  { %p2055_p12 = scmp.ne.s32.totalorder %s2639_s9, %s2054_s15  ;;  %p2058_p13 = scmp.lt.u32.totalorder %s2054_s15, %s2639_s9 }
  0x5e   :  { %p2060_p0 = pnand %p2058_p13, %p2055_p12 }
  0x60   :  { %2063 = shalt.err (!%p2060_p0)
}
  0x61   :  { %s2064_s16 = scalar_lea.vmem %s82_s7, 16  ;;  %s2068_s20 = scalar_lea.vmem %s82_s7, 32 }
  0x62   :  { %p2065_p1 = scmp.ne.s32.totalorder %s82_s7, %s2064_s16  ;;  %p2069_p2 = scmp.lt.s32.totalorder %s82_s7, %s82_s7 }
  0x63   :  { %p2070_p3 = scmp.lt.s32.totalorder %s2068_s20, %s2064_s16 }
  0x65   :  { %p2071_p4 = por %p2070_p3, %p2069_p2 }
  0x67   :  { %p2072_p5 = pnand %p2071_p4, %p2065_p1 }
  0x69   :  { %2075 = shalt.err (!%p2072_p5)
}
  0x6a   :  { %84 = dma.hbm_to_vmem [thread:$0]  %s2639_s9, 16, %s82_s7, [#allocation9]  }
  0x6b   :  { %s2160_s21 = smov [#allocation13]   ;;  %s2161_s5 = smov [#allocation14]  }
  0x6c   :  { %s103_s22 = sshll.u32 %s2160_s21, 4  ;;  %s113_s30 = sshll.u32 %s2161_s5, 4  ;;  %s104_s22 = int_to_ptr.vmem [resolvable:$true] %s103_s22  ;;  %s114_s30 = int_to_ptr.vmem [resolvable:$true] %s113_s30 }
  0x6d   :  { %s2076_s26 = scalar_lea.hbm %s2642_s12, 16 }
  0x6e   :  { %p2077_p6 = scmp.ne.s32.totalorder %s2642_s12, %s2076_s26  ;;  %p2080_p7 = scmp.lt.u32.totalorder %s2076_s26, %s2642_s12 }
  0x70   :  { %p2082_p8 = pnand %p2080_p7, %p2077_p6 }
  0x72   :  { %2085 = shalt.err (!%p2082_p8)
}
  0x73   :  { %s2086_s9 = scalar_lea.vmem %s104_s22, 16  ;;  %s2090_s7 = scalar_lea.vmem %s104_s22, 32 }
  0x74   :  { %p2087_p9 = scmp.ne.s32.totalorder %s104_s22, %s2086_s9  ;;  %p2091_p10 = scmp.lt.s32.totalorder %s104_s22, %s104_s22 }
  0x75   :  { %p2092_p11 = scmp.lt.s32.totalorder %s2090_s7, %s2086_s9 }
  0x77   :  { %p2093_p12 = por %p2092_p11, %p2091_p10 }
  0x79   :  { %p2094_p13 = pnand %p2093_p12, %p2087_p9 }
  0x7b   :  { %2097 = shalt.err (!%p2094_p13)
}
  0x7c   :  { %106 = dma.hbm_to_vmem [thread:$0]  %s2642_s12, 16, %s104_s22, [#allocation12]  }
  0x7d   :  { %s2098_s19 = scalar_lea.hbm %s2643_s13, 16 }
  0x7e   :  { %p2099_p0 = scmp.ne.s32.totalorder %s2643_s13, %s2098_s19  ;;  %p2102_p1 = scmp.lt.u32.totalorder %s2098_s19, %s2643_s13 }
  0x80   :  { %p2104_p2 = pnand %p2102_p1, %p2099_p0 }
  0x82   :  { %2107 = shalt.err (!%p2104_p2)
}
  0x83   :  { %s2108_s21 = scalar_lea.vmem %s114_s30, 16  ;;  %s2112_s5 = scalar_lea.vmem %s114_s30, 32 }
  0x84   :  { %p2109_p3 = scmp.ne.s32.totalorder %s114_s30, %s2108_s21  ;;  %p2113_p4 = scmp.lt.s32.totalorder %s114_s30, %s114_s30 }
  0x85   :  { %p2114_p5 = scmp.lt.s32.totalorder %s2112_s5, %s2108_s21 }
  0x87   :  { %p2115_p6 = por %p2114_p5, %p2113_p4 }
  0x89   :  { %p2116_p7 = pnand %p2115_p6, %p2109_p3 }
  0x8b   :  { %2119 = shalt.err (!%p2116_p7)
}
  0x8c   :  { %116 = dma.hbm_to_vmem [thread:$0]  %s2643_s13, 16, %s114_s30, [#allocation15]  }
  0x8d   :  { %2142 = dma.done.wait [#allocation3], 16  }
  0x8e   :  { %2143 = vsyncadd [#allocation3], 4294967280 }
  0x8f   :  { %2144 = dma.done.wait [#allocation6], 32  }
  0x90   :  { %2145 = vsyncadd [#allocation6], 4294967264 }
  0x91   :  { %2146 = dma.done.wait [#allocation9], 32  }
  0x92   :  { %2147 = vsyncadd [#allocation9], 4294967264 }
  0x93   :  { %2148 = dma.done.wait [#allocation12], 32  }
  0x94   :  { %2149 = vsyncadd [#allocation12], 4294967264 }
  0x95   :  { %2150 = dma.done.wait [#allocation15], 16  }
  0x96   :  { %2151 = vsyncadd [#allocation15], 4294967280  ;;  %v2162_v0 = vmov 0.0   ;;  %vm2163_vm0 = vmmov 0   ;;  %v1896_v1 = vld [vmem:[%s2632_s2] sm:$0xff]   ;;  %v1897_v2 = vld [vmem:[%s2632_s2 + $0x8] sm:$0xff]   ;;  %v226_v21 = vlaneseq }
  0x97   :  { %1722 = vmatprep.subr.bf16.mxu1 %v2162_v0  ;;  %1726 = vmatprep.mubr.msk.bf16.mxu1 %vm2163_vm0, %v2162_v0  ;;  %v2366_v3 = vld [vmem:[%s2630_s0] sm:$0xff]  ;;  %v2371_v4 = vld [vmem:[%s2630_s0 + $0x8] sm:$0xff]  ;;  %vm168_vm1 = vcmask 261120   ;;  %s2164_s0 = smov 96   ;;  %vm250_vm2 = vcmask 64512   ;;  %v2166_v30 = vmov 0  }
  0x98   :  { %1736 = vmatprep.subr.bf16.mxu0 %v2162_v0  ;;  %1738 = vmatprep.mubr.msk.bf16.mxu0 %vm2163_vm0, %v2162_v0  ;;  %v144_v5 = vpack.c.bf16 %v2371_v4, %v2366_v3  ;;  %v1631_v6 = vld [vmem:[#allocation2] ss:$0 sm:$0xff]  ;;  %v2165_v19 = vmov 1966171168   ;;  %v227_v23 = vshrl.u32 %v226_v21, 7  ;;  %s2168_s9 = smov 88  }
  0x99   :  { %1723 = vmatpush3.bf16.msra.mxu1 %v1896_v1  ;;  %v224_v20 = vunpack.c.l.s4 %v2165_v19  ;;  %v1635_v25 = vld.sshfl [vmem:[%s2631_s1] sm:$0x11 pattern:$0x75316420]  ;;  %s2167_s1 = smov 64   ;;  %vm391_vm7 = vcmask 1043456  }
  0x9a   :  { %1724 = vmatprep.subr.bf16.mxu1 %v2162_v0  ;;  %v222_v26 = vcombine.high %v1635_v25, %v1635_v25  ;;  %v352_v29 = vsub.s32 0, %v227_v23  ;;  %s2169_s7 = smov 120   ;;  %s2170_s15 = smov 56   ;;  %vm1517_vm8 = vcmask 523264  }
  0x9b   :  { %v225_v22 = vunpack.c.0.s8 %v224_v20  ;;  %s2171_s11 = smov 112   ;;  %s2172_s24 = smov 80  }
  0x9c   :  { %s2173_s6 = smov 48   ;;  %s2174_s18 = smov 72  }
  0x9d   :  { %1725 = vmatpush3.bf16.msra.mxu1 %v1897_v2  ;;  %v228_v24 = vsub.s32 %v225_v22, %v227_v23  ;;  %s2175_s21 = smov 104   ;;  %s2176_s22 = smov 40  }
  0x9e   :  { %1730 = vmatprep.subr.bf16.mxu1 %v2162_v0 }
  0x9f   :  { %v229_v27 = vrot.slane %v1635_v25, %v228_v24  ;;  %v236_v28 = vrot.slane %v222_v26, %v228_v24 }
  0xa0   :  { %1727 = vmatmul.mubr.msk.bf16.vlgmr.msra.gmra.mrb[0].mxu1 %vm168_vm1, %v144_v5 }
  0xa1   :  { %1732 = vmatprep.mubr.msk.bf16.mxu1 %vm2163_vm0, %v2162_v0  ;;  %vm239_vm3 = vcmp.eq.f32.partialorder %v229_v27, 0.0  ;;  %vm240_vm4 = vcmp.eq.f32.partialorder %v236_v28, 0.0 }
  0xa2   :  { %v348_v31 = vsel %vm239_vm3, 1, %v2166_v30  ;;  %v349_v33 = vsel %vm240_vm4, 1, %v2166_v30 }
  0xa3   :  { %v2401_v32 = vrot.slane %v348_v31, %v352_v29  ;;  %v2404_v35 = vrot.slane %v349_v33, %v352_v29 }
  0xa5   :  { %vm358_vm5 = vcmp.eq.s32.totalorder %v2401_v32, 1  ;;  %vm359_vm6 = vcmp.eq.s32.totalorder %v2404_v35, 1 }
 0x173   :  { %v206_v7 = vpop.f32.mrb[0].mxu1 }
 0x174   :  { %v207_v8 = vadd.f32 %v1631_v6, %v206_v7  ;;  %v1728_v9 = vpop.f32.mrb[1].mxu1 }
 0x175   :  { %v209_v10 = vpop.f32.mrb[2].mxu1 }
 0x176   :  { %v2380_v11 = vpack.c.bf16 %v207_v8, %v207_v8  ;;  %v210_v12 = vadd.f32 %v1631_v6, %v209_v10  ;;  %v1729_v13 = vpop.f32.mrb[3].mxu1 }
 0x178   :  { %248 = vrot.lane.b32.xlu0 %v2380_v11, %s2164_s0  ;;  %v2383_v14 = vpack.c.bf16 %v210_v12, %v210_v12 }
 0x17c   :  { %298 = vrot.lane.b32.xlu0 %v2383_v14, %s2164_s0 }
 0x1ea   :  { %v249_v15 = vpop.permute.xlu0 %248 }
 0x1eb   :  { %v255_v16 = vsel %vm250_vm2, %v249_v15, 0 }
 0x1ec   :  { %1731 = vmatpush3.bf16.xpose.msra.mxu1 %v255_v16 }
 0x1ed   :  { %1742 = vmatprep.subr.bf16.mxu1 %v2162_v0 }
 0x1ee   :  { %v299_v17 = vpop.permute.xlu0 %298 }
 0x1ef   :  { %v304_v18 = vsel %vm250_vm2, %v299_v17, 0 }
 0x1f0   :  { %1737 = vmatpush3.bf16.xpose.msra.mxu0 %v304_v18 }
 0x1f1   :  { %1748 = vmatprep.subr.bf16.mxu0 %v2162_v0 }
 0x1f3   :  { %1733 = vmatmul.mubr.msk.bf16.vlgmr.msra.gmra.mrb[4].mxu1 %vm250_vm2, %v2380_v11 }
 0x1f4   :  { %1744 = vmatprep.mubr.msk.bf16.mxu1 %vm2163_vm0, %v2162_v0 }
 0x1f7   :  { %1739 = vmatmul.mubr.msk.bf16.vlgmr.msra.gmra.mrb[0].mxu0 %vm250_vm2, %v2383_v14 }
 0x1f8   :  { %1750 = vmatprep.mubr.msk.bf16.mxu0 %vm2163_vm0, %v2162_v0 }
 0x2c6   :  { %v291_v34 = vpop.f32.mrb[4].mxu1 }
 0x2c7   :  { %v346_v36 = vmul.f32 0.35355338, %v291_v34  ;;  %v1734_v37 = vpop.f32.mrb[5].mxu1 }
 0x2c8   :  { %v294_v38 = vpop.f32.mrb[6].mxu1 }
 0x2c9   :  { %v1735_v39 = vpop.f32.mrb[7].mxu1  ;;  %v360_v40 = vsel %vm358_vm5, -1e+10, %v346_v36 }
 0x2ca   :  { %v340_v41 = vpop.f32.mrb[0].mxu0  ;;  %v362_v42 = vsel %vm250_vm2, %v360_v40, -inf }
 0x2cb   :  { %v347_v43 = vmul.f32 0.35355338, %v340_v41  ;;  %v1740_v44 = vpop.f32.mrb[1].mxu0  ;;  %363 = vmax.xlane.f32.xlu1 %v362_v42 }
 0x2cc   :  { %v343_v45 = vpop.f32.mrb[2].mxu0 }
 0x2cd   :  { %v1741_v46 = vpop.f32.mrb[3].mxu0  ;;  %v361_v47 = vsel %vm359_vm6, -1e+10, %v347_v43 }
 0x2ce   :  { %v365_v48 = vsel %vm250_vm2, %v361_v47, -inf }
 0x2cf   :  { %366 = vmax.xlane.f32.xlu1 %v365_v48 }
 0x2e0   :  { %386 = vrot.lane.b32.xlu1 %v2380_v11, %s2167_s1 }
 0x2e4   :  { %435 = vrot.lane.b32.xlu1 %v2383_v14, %s2167_s1 }
 0x2e8   :  { %486 = vrot.lane.b32.xlu1 %v2380_v11, %s2168_s9 }
 0x358   :  { %v364_v49 = vpop.xlane.xlu1 %363 }
 0x359   :  { %v368_v50 = vsub.f32 %v360_v40, %v364_v49 }
 0x35b   :  { %v370_v51 = vmul.f32 1.442695, %v368_v50 }
 0x35c   :  { %v367_v52 = vpop.xlane.xlu1 %366 }
 0x35d   :  { %1904 = vpow2.f32 %v370_v51  ;;  %v369_v53 = vsub.f32 %v361_v47, %v367_v52 }
 0x35f   :  { %v372_v54 = vmul.f32 1.442695, %v369_v53 }
 0x360   :  { %v387_v55 = vpop.permute.xlu1 %386 }
 0x361   :  { %1906 = vpow2.f32 %v372_v54  ;;  %v393_v56 = vsel %vm391_vm7, %v387_v55, 0 }
 0x362   :  { %1743 = vmatpush3.bf16.msra.mxu1 %v393_v56 }
 0x363   :  { %1754 = vmatprep.subr.bf16.mxu1 %v2162_v0 }
 0x364   :  { %v436_v57 = vpop.permute.xlu1 %435 }
 0x365   :  { %v441_v58 = vsel %vm391_vm7, %v436_v57, 0 }
 0x366   :  { %1749 = vmatpush3.bf16.msra.mxu0 %v441_v58 }
 0x367   :  { %v1905_v59 = vpop.eup %1904  ;;  %1760 = vmatprep.subr.bf16.mxu0 %v2162_v0 }
 0x368   :  { %v374_v60 = vsel %vm250_vm2, %v1905_v59, 0.0  ;;  %v487_v63 = vpop.permute.xlu1 %486 }
 0x369   :  { %375 = vadd.xlane.f32.xlu0 %v374_v60  ;;  %v492_v9 = vsel %vm250_vm2, %v487_v63, 0  ;;  %v242_v60 = vld [vmem:[%s2634_s4 + $0x4] sm:$0xf] }
 0x36a   :  { %v713_v63 = vsel %vm391_vm7, %v242_v60, 0 }
 0x36b   :  { %v1907_v61 = vpop.eup %1906 }
 0x36c   :  { %v377_v62 = vsel %vm250_vm2, %v1907_v61, 0.0 }
 0x36d   :  { %378 = vadd.xlane.f32.xlu1 %v377_v62 }
 0x37e   :  { %536 = vrot.lane.b32.xlu1 %v2383_v14, %s2168_s9 }
 0x37f   :  { %484 = vrot.lane.b32.xlu0 %v2380_v11, %s2169_s7 }
 0x382   :  { %534 = vrot.lane.b32.xlu1 %v2383_v14, %s2169_s7 }
 0x3f6   :  { %v376_v1 = vpop.xlane.xlu0 %375 }
 0x3f7   :  { %1908 = vrcp.f32 %v376_v1 }
 0x3fa   :  { %v379_v2 = vpop.xlane.xlu1 %378  ;;  %v485_v16 = vpop.permute.xlu0 %484 }
 0x3fb   :  { %1910 = vrcp.f32 %v379_v2  ;;  %v241_v2 = vld [vmem:[%s2634_s4] sm:$0xf] }
 0x3fe   :  { %v537_v12 = vpop.permute.xlu1 %536 }
 0x3ff   :  { %v542_v15 = vsel %vm250_vm2, %v537_v12, 0 }
 0x401   :  { %v1909_v5 = vpop.eup %1908 }
 0x402   :  { %v382_v6 = vmul.f32 %v1909_v5, %v1905_v59  ;;  %v535_v17 = vpop.permute.xlu1 %534 }
 0x404   :  { %v384_v7 = vpack.c.bf16 %v382_v6, %v382_v6 }
 0x405   :  { %v1911_v8 = vpop.eup %1910 }
 0x406   :  { %v383_v10 = vmul.f32 %v1911_v8, %v1907_v61  ;;  %1745 = vmatmul.mubr.msk.bf16.vlgmr.msra.gmra.mrb[8].mxu1 %vm250_vm2, %v384_v7  ;;  %v760_v7 = vsel %vm391_vm7, %v241_v2, 0 }
 0x407   :  { %1755 = vmatpush3.bf16.xpose.msra.mxu1 %v492_v9  ;;  %1756 = vmatprep.mubr.msk.bf16.mxu1 %vm2163_vm0, %v2162_v0 }
 0x408   :  { %v385_v13 = vpack.c.bf16 %v383_v10, %v383_v10  ;;  %1766 = vmatprep.subr.bf16.mxu1 %v2162_v0 }
 0x40a   :  { %1751 = vmatmul.mubr.msk.bf16.vlgmr.msra.gmra.mrb[4].mxu0 %vm250_vm2, %v385_v13 }
 0x40b   :  { %1761 = vmatpush3.bf16.xpose.msra.mxu0 %v542_v15  ;;  %1762 = vmatprep.mubr.msk.bf16.mxu0 %vm2163_vm0, %v2162_v0 }
 0x40c   :  { %1772 = vmatprep.subr.bf16.mxu0 %v2162_v0 }
 0x40e   :  { %1757 = vmatmul.mubr.msk.bf16.vlgmr.msra.gmra.mrb[12].mxu1 %vm250_vm2, %v485_v16 }
 0x40f   :  { %1768 = vmatprep.mubr.msk.bf16.mxu1 %vm2163_vm0, %v2162_v0 }
 0x412   :  { %1763 = vmatmul.mubr.msk.bf16.vlgmr.msra.gmra.mrb[8].mxu0 %vm250_vm2, %v535_v17 }
 0x413   :  { %1774 = vmatprep.mubr.msk.bf16.mxu0 %vm2163_vm0, %v2162_v0 }
 0x4d9   :  { %v2441_v18 = vpop.f32.mrb[8].mxu1 }
 0x4da   :  { %v1746_v19 = vpop.f32.mrb[9].mxu1 }
 0x4db   :  { %v432_v20 = vpop.f32.mrb[10].mxu1 }
 0x4dc   :  { %v1747_v21 = vpop.f32.mrb[11].mxu1 }
 0x4dd   :  { %v2443_v22 = vpop.f32.mrb[4].mxu0 }
 0x4de   :  { %v483_v23 = vpack.c.bf16 %v2443_v22, %v2441_v18  ;;  %v1752_v24 = vpop.f32.mrb[5].mxu0 }
 0x4df   :  { %v480_v25 = vpop.f32.mrb[6].mxu0 }
 0x4e0   :  { %v1753_v26 = vpop.f32.mrb[7].mxu0 }
 0x4e1   :  { %v528_v27 = vpop.f32.mrb[12].mxu1 }
 0x4e2   :  { %v584_v28 = vmul.f32 0.35355338, %v528_v27  ;;  %v1758_v29 = vpop.f32.mrb[13].mxu1 }
 0x4e3   :  { %v531_v30 = vpop.f32.mrb[14].mxu1 }
 0x4e4   :  { %v1759_v31 = vpop.f32.mrb[15].mxu1  ;;  %v586_v33 = vsel %vm358_vm5, -1e+10, %v584_v28 }
 0x4e5   :  { %v578_v34 = vpop.f32.mrb[8].mxu0  ;;  %v588_v36 = vsel %vm250_vm2, %v586_v33, -inf }
 0x4e6   :  { %v585_v37 = vmul.f32 0.35355338, %v578_v34  ;;  %v1764_v38 = vpop.f32.mrb[9].mxu0  ;;  %589 = vmax.xlane.f32.xlu1 %v588_v36 }
 0x4e7   :  { %v581_v39 = vpop.f32.mrb[10].mxu0 }
 0x4e8   :  { %v1765_v40 = vpop.f32.mrb[11].mxu0  ;;  %v587_v41 = vsel %vm359_vm6, -1e+10, %v585_v37 }
 0x4e9   :  { %v591_v42 = vsel %vm250_vm2, %v587_v41, -inf }
 0x4ea   :  { %592 = vmax.xlane.f32.xlu0 %v591_v42 }
 0x500   :  { %660 = vrot.lane.b32.xlu0 %v2383_v14, %s2170_s15 }
 0x504   :  { %803 = vrot.lane.b32.xlu0 %v2380_v11, %s2171_s11 }
 0x573   :  { %v590_v43 = vpop.xlane.xlu1 %589 }
 0x574   :  { %v594_v44 = vsub.f32 %v586_v33, %v590_v43 }
 0x576   :  { %v596_v45 = vmul.f32 1.442695, %v594_v44 }
 0x577   :  { %v593_v46 = vpop.xlane.xlu0 %592 }
 0x578   :  { %1912 = vpow2.f32 %v596_v45  ;;  %v595_v47 = vsub.f32 %v587_v41, %v593_v46 }
 0x57a   :  { %v598_v48 = vmul.f32 1.442695, %v595_v47 }
 0x57b   :  { %v661_v49 = vpop.permute.xlu0 %660 }
 0x57c   :  { %1914 = vpow2.f32 %v598_v48  ;;  %v666_v50 = vsel %vm391_vm7, %v661_v49, 0 }
 0x57d   :  { %1773 = vmatpush3.bf16.msra.mxu0 %v666_v50 }
 0x57e   :  { %1784 = vmatprep.subr.bf16.mxu0 %v2162_v0 }
 0x57f   :  { %v804_v26 = vpop.permute.xlu0 %803 }
 0x582   :  { %v1913_v51 = vpop.eup %1912 }
 0x583   :  { %v600_v52 = vsel %vm250_vm2, %v1913_v51, 0.0 }
 0x584   :  { %601 = vadd.xlane.f32.xlu1 %v600_v52 }
 0x586   :  { %v1915_v53 = vpop.eup %1914 }
 0x587   :  { %v603_v54 = vsel %vm250_vm2, %v1915_v53, 0.0 }
 0x588   :  { %604 = vadd.xlane.f32.xlu1 %v603_v54 }
 0x599   :  { %612 = vrot.lane.b32.xlu1 %v2380_v11, %s2170_s15 }
 0x59d   :  { %805 = vrot.lane.b32.xlu1 %v2380_v11, %s2172_s24 }
 0x5a1   :  { %855 = vrot.lane.b32.xlu1 %v2383_v14, %s2172_s24 }
 0x5a5   :  { %853 = vrot.lane.b32.xlu1 %v2383_v14, %s2171_s11 }
 0x611   :  { %v602_v55 = vpop.xlane.xlu1 %601 }
 0x612   :  { %1916 = vrcp.f32 %v602_v55 }
 0x615   :  { %v605_v56 = vpop.xlane.xlu1 %604 }
 0x616   :  { %1918 = vrcp.f32 %v605_v56 }
 0x619   :  { %v613_v57 = vpop.permute.xlu1 %612 }
 0x61a   :  { %v618_v58 = vsel %vm391_vm7, %v613_v57, 0 }
 0x61b   :  { %1767 = vmatpush3.bf16.msra.mxu1 %v618_v58 }
 0x61c   :  { %v1917_v59 = vpop.eup %1916  ;;  %1778 = vmatprep.subr.bf16.mxu1 %v2162_v0 }
 0x61d   :  { %v608_v61 = vmul.f32 %v1917_v59, %v1913_v51  ;;  %v806_v8 = vpop.permute.xlu1 %805 }
 0x61e   :  { %v811_v22 = vsel %vm250_vm2, %v806_v8, 0 }
 0x61f   :  { %v610_v62 = vpack.c.bf16 %v608_v61, %v608_v61 }
 0x620   :  { %v1919_v1 = vpop.eup %1918 }
 0x621   :  { %v609_v5 = vmul.f32 %v1919_v1, %v1915_v53  ;;  %1769 = vmatmul.mubr.msk.bf16.vlgmr.msra.gmra.mrb[16].mxu1 %vm250_vm2, %v610_v62  ;;  %v856_v9 = vpop.permute.xlu1 %855 }
 0x622   :  { %1779 = vmatpush3.bf16.msra.mxu1 %v713_v63  ;;  %1780 = vmatprep.mubr.msk.bf16.mxu1 %vm2163_vm0, %v2162_v0  ;;  %v861_v10 = vsel %vm250_vm2, %v856_v9, 0 }
 0x623   :  { %v611_v6 = vpack.c.bf16 %v609_v5, %v609_v5  ;;  %1790 = vmatprep.subr.bf16.mxu1 %v2162_v0 }
 0x625   :  { %1775 = vmatmul.mubr.msk.bf16.vlgmr.msra.gmra.mrb[12].mxu0 %vm250_vm2, %v611_v6  ;;  %v854_v12 = vpop.permute.xlu1 %853 }
 0x626   :  { %1785 = vmatpush3.bf16.msra.mxu0 %v760_v7  ;;  %1786 = vmatprep.mubr.msk.bf16.mxu0 %vm2163_vm0, %v2162_v0 }
 0x627   :  { %1796 = vmatprep.subr.bf16.mxu0 %v2162_v0 }
 0x62d   :  { %1787 = vmatmul.mubr.msk.bf16.vlgmr.msra.gmra.mrb[16].mxu0 %vm250_vm2, %v483_v23 }
 0x62e   :  { %1798 = vmatprep.mubr.msk.bf16.mxu0 %vm2163_vm0, %v2162_v0 }
 0x62f   :  { %1797 = vmatpush3.bf16.xpose.msra.mxu0 %v861_v10 }
 0x630   :  { %1808 = vmatprep.subr.bf16.mxu0 %v2162_v0 }
 0x636   :  { %1799 = vmatmul.mubr.msk.bf16.vlgmr.msra.gmra.mrb[20].mxu0 %vm250_vm2, %v854_v12 }
 0x637   :  { %1810 = vmatprep.mubr.msk.bf16.mxu0 %vm2163_vm0, %v2162_v0 }
 0x6f4   :  { %v654_v13 = vpop.f32.mrb[16].mxu1 }
 0x6f5   :  { %v1770_v15 = vpop.f32.mrb[17].mxu1 }
 0x6f6   :  { %v657_v16 = vpop.f32.mrb[18].mxu1 }
 0x6f7   :  { %v1771_v17 = vpop.f32.mrb[19].mxu1 }
 0x6f8   :  { %v702_v18 = vpop.f32.mrb[12].mxu0  ;;  %v243_v17 = vld [vmem:[%s2634_s4 + $0x8] sm:$0xf] }
 0x6f9   :  { %v708_v19 = vpack.c.bf16 %v702_v18, %v654_v13  ;;  %v1776_v20 = vpop.f32.mrb[13].mxu0  ;;  %v1032_v18 = vsel %vm391_vm7, %v243_v17, 0 }
 0x6fa   :  { %v705_v21 = vpop.f32.mrb[14].mxu0 }
 0x6fb   :  { %v1777_v23 = vpop.f32.mrb[15].mxu0  ;;  %1781 = vmatmul.mubr.msk.bf16.vlgmr.msra.gmra.mrb[20].mxu1 %vm250_vm2, %v708_v19 }
 0x6fc   :  { %1791 = vmatpush3.bf16.xpose.msra.mxu1 %v811_v22  ;;  %1792 = vmatprep.mubr.msk.bf16.mxu1 %vm2163_vm0, %v2162_v0 }
 0x6fd   :  { %1802 = vmatprep.subr.bf16.mxu1 %v2162_v0 }
 0x700   :  { %v796_v24 = vpop.f32.mrb[16].mxu0 }
 0x701   :  { %v1788_v25 = vpop.f32.mrb[17].mxu0 }
 0x702   :  { %v799_v27 = vpop.f32.mrb[18].mxu0 }
 0x703   :  { %v1789_v28 = vpop.f32.mrb[19].mxu0  ;;  %1793 = vmatmul.mubr.msk.bf16.vlgmr.msra.gmra.mrb[24].mxu1 %vm250_vm2, %v804_v26 }
 0x704   :  { %1804 = vmatprep.mubr.msk.bf16.mxu1 %vm2163_vm0, %v2162_v0 }
 0x709   :  { %v897_v29 = vpop.f32.mrb[20].mxu0 }
 0x70a   :  { %v904_v30 = vmul.f32 0.35355338, %v897_v29  ;;  %v1800_v31 = vpop.f32.mrb[21].mxu0 }
 0x70b   :  { %v900_v33 = vpop.f32.mrb[22].mxu0 }
 0x70c   :  { %v1801_v34 = vpop.f32.mrb[23].mxu0  ;;  %v906_v36 = vsel %vm359_vm6, -1e+10, %v904_v30 }
 0x70d   :  { %v910_v37 = vsel %vm250_vm2, %v906_v36, -inf }
 0x70e   :  { %911 = vmax.xlane.f32.xlu1 %v910_v37 }
 0x71f   :  { %931 = vrot.lane.b32.xlu1 %v2380_v11, %s2173_s6 }
 0x723   :  { %1079 = vrot.lane.b32.xlu1 %v2380_v11, %s2174_s18 }
 0x727   :  { %1129 = vrot.lane.b32.xlu1 %v2383_v14, %s2174_s18 }
 0x72b   :  { %1127 = vrot.lane.b32.xlu1 %v2383_v14, %s2175_s21 }
 0x79b   :  { %v912_v38 = vpop.xlane.xlu1 %911 }
 0x79c   :  { %v914_v41 = vsub.f32 %v906_v36, %v912_v38 }
 0x79e   :  { %v917_v42 = vmul.f32 1.442695, %v914_v41 }
 0x79f   :  { %v932_v39 = vpop.permute.xlu1 %931 }
 0x7a0   :  { %v937_v40 = vsel %vm391_vm7, %v932_v39, 0  ;;  %1920 = vpow2.f32 %v917_v42 }
 0x7a1   :  { %1803 = vmatpush3.bf16.msra.mxu1 %v937_v40 }
 0x7a2   :  { %1814 = vmatprep.subr.bf16.mxu1 %v2162_v0 }
 0x7a3   :  { %v1080_v10 = vpop.permute.xlu1 %1079 }
 0x7a4   :  { %v1085_v13 = vsel %vm250_vm2, %v1080_v10, 0 }
 0x7a7   :  { %v1130_v23 = vpop.permute.xlu1 %1129 }
 0x7a8   :  { %v1135_v28 = vsel %vm250_vm2, %v1130_v23, 0 }
 0x7aa   :  { %v1921_v56 = vpop.eup %1920 }
 0x7ab   :  { %v922_v57 = vsel %vm250_vm2, %v1921_v56, 0.0  ;;  %v1128_v38 = vpop.permute.xlu1 %1127 }
 0x7ce   :  { %v749_v43 = vpop.f32.mrb[20].mxu1 }
 0x7cf   :  { %v2511_v44 = vadd.f32 %v796_v24, %v749_v43  ;;  %v1782_v45 = vpop.f32.mrb[21].mxu1 }
 0x7d0   :  { %v752_v46 = vpop.f32.mrb[22].mxu1 }
 0x7d1   :  { %v2513_v47 = vadd.f32 %v799_v27, %v752_v46  ;;  %v1783_v48 = vpop.f32.mrb[23].mxu1 }
 0x7d6   :  { %v847_v49 = vpop.f32.mrb[24].mxu1 }
 0x7d7   :  { %v903_v50 = vmul.f32 0.35355338, %v847_v49  ;;  %v1794_v51 = vpop.f32.mrb[25].mxu1 }
 0x7d8   :  { %v850_v52 = vpop.f32.mrb[26].mxu1 }
 0x7d9   :  { %v1795_v53 = vpop.f32.mrb[27].mxu1  ;;  %v905_v54 = vsel %vm358_vm5, -1e+10, %v903_v50 }
 0x7da   :  { %v907_v55 = vsel %vm250_vm2, %v905_v54, -inf }
 0x7db   :  { %908 = vmax.xlane.f32.xlu0 %v907_v55 }
 0x7df   :  { %923 = vadd.xlane.f32.xlu0 %v922_v57 }
 0x868   :  { %v909_v58 = vpop.xlane.xlu0 %908 }
 0x869   :  { %v913_v59 = vsub.f32 %v905_v54, %v909_v58 }
 0x86b   :  { %v915_v60 = vmul.f32 1.442695, %v913_v59 }
 0x86c   :  { %v924_v63 = vpop.xlane.xlu0 %923 }
 0x86d   :  { %1922 = vpow2.f32 %v915_v60 }
 0x86e   :  { %1924 = vrcp.f32 %v924_v63 }
 0x877   :  { %v1923_v61 = vpop.eup %1922 }
 0x878   :  { %v919_v62 = vsel %vm250_vm2, %v1923_v61, 0.0  ;;  %v1925_v1 = vpop.eup %1924 }
 0x879   :  { %920 = vadd.xlane.f32.xlu0 %v919_v62  ;;  %v928_v5 = vmul.f32 %v1925_v1, %v1921_v56 }
 0x87b   :  { %v930_v8 = vpack.c.bf16 %v928_v5, %v928_v5  ;;  %v244_v5 = vld [vmem:[%s2634_s4 + $0xc] sm:$0xf] }
 0x88f   :  { %979 = vrot.lane.b32.xlu0 %v2383_v14, %s2173_s6 }
 0x893   :  { %1077 = vrot.lane.b32.xlu0 %v2380_v11, %s2175_s21 }
 0x906   :  { %v921_v2 = vpop.xlane.xlu0 %920 }
 0x907   :  { %1926 = vrcp.f32 %v921_v2 }
 0x90a   :  { %v980_v6 = vpop.permute.xlu0 %979 }
 0x90b   :  { %v985_v7 = vsel %vm391_vm7, %v980_v6, 0  ;;  %v1306_v6 = vsel %vm391_vm7, %v244_v5, 0  ;;  %v1659_v5 = vld [vmem:[#allocation10] ss:$0 sm:$0xff] }
 0x90c   :  { %1809 = vmatpush3.bf16.msra.mxu0 %v985_v7 }
 0x90d   :  { %1820 = vmatprep.subr.bf16.mxu0 %v2162_v0 }
 0x90e   :  { %v1078_v16 = vpop.permute.xlu0 %1077 }
 0x90f   :  { %1811 = vmatmul.mubr.msk.bf16.vlgmr.msra.gmra.mrb[24].mxu0 %vm250_vm2, %v930_v8 }
 0x910   :  { %1822 = vmatprep.mubr.msk.bf16.mxu0 %vm2163_vm0, %v2162_v0 }
 0x911   :  { %v1927_v9 = vpop.eup %1926 }
 0x912   :  { %v927_v12 = vmul.f32 %v1927_v9, %v1923_v61 }
 0x914   :  { %v929_v15 = vpack.c.bf16 %v927_v12, %v927_v12 }
 0x915   :  { %1821 = vmatpush3.bf16.xpose.msra.mxu0 %v1085_v13 }
 0x916   :  { %1805 = vmatmul.mubr.msk.bf16.vlgmr.msra.gmra.mrb[28].mxu1 %vm250_vm2, %v929_v15  ;;  %1832 = vmatprep.subr.bf16.mxu0 %v2162_v0 }
 0x917   :  { %1816 = vmatprep.mubr.msk.bf16.mxu1 %vm2163_vm0, %v2162_v0  ;;  %1815 = vmatpush3.bf16.msra.mxu1 %v1032_v18 }
 0x918   :  { %1826 = vmatprep.subr.bf16.mxu1 %v2162_v0 }
 0x91c   :  { %1823 = vmatmul.mubr.msk.bf16.vlgmr.msra.gmra.mrb[28].mxu0 %vm250_vm2, %v1078_v16 }
 0x91d   :  { %1834 = vmatprep.mubr.msk.bf16.mxu0 %vm2163_vm0, %v2162_v0 }
 0x9e2   :  { %v1021_v19 = vpop.f32.mrb[24].mxu0 }
 0x9e3   :  { %v1812_v20 = vpop.f32.mrb[25].mxu0 }
 0x9e4   :  { %v1024_v21 = vpop.f32.mrb[26].mxu0 }
 0x9e5   :  { %v1813_v22 = vpop.f32.mrb[27].mxu0 }
 0x9e9   :  { %v973_v24 = vpop.f32.mrb[28].mxu1 }
 0x9ea   :  { %v1027_v25 = vpack.c.bf16 %v1021_v19, %v973_v24  ;;  %v1806_v26 = vpop.f32.mrb[29].mxu1  ;;  %v1656_v24 = vld [vmem:[#allocation5] ss:$0 sm:$0xff] }
 0x9eb   :  { %v976_v27 = vpop.f32.mrb[30].mxu1 }
 0x9ec   :  { %v1807_v29 = vpop.f32.mrb[31].mxu1  ;;  %1817 = vmatmul.mubr.msk.bf16.vlgmr.msra.gmra.mrb[32].mxu1 %vm250_vm2, %v1027_v25 }
 0x9ed   :  { %1827 = vmatpush3.bf16.xpose.msra.mxu1 %v1135_v28  ;;  %1828 = vmatprep.mubr.msk.bf16.mxu1 %vm2163_vm0, %v2162_v0 }
 0x9ee   :  { %1838 = vmatprep.subr.bf16.mxu1 %v2162_v0 }
 0x9ef   :  { %v1121_v30 = vpop.f32.mrb[28].mxu0 }
 0x9f0   :  { %v1177_v31 = vmul.f32 0.35355338, %v1121_v30  ;;  %v1824_v33 = vpop.f32.mrb[29].mxu0 }
 0x9f1   :  { %v1124_v34 = vpop.f32.mrb[30].mxu0 }
 0x9f2   :  { %v1825_v36 = vpop.f32.mrb[31].mxu0  ;;  %v1179_v37 = vsel %vm358_vm5, -1e+10, %v1177_v31 }
 0x9f3   :  { %v1181_v39 = vsel %vm250_vm2, %v1179_v37, -inf }
 0x9f4   :  { %1182 = vmax.xlane.f32.xlu0 %v1181_v39  ;;  %1829 = vmatmul.mubr.msk.bf16.vlgmr.msra.gmra.mrb[36].mxu1 %vm250_vm2, %v1128_v38 }
 0x9f5   :  { %1840 = vmatprep.mubr.msk.bf16.mxu1 %vm2163_vm0, %v2162_v0 }
 0xa81   :  { %v1183_v40 = vpop.xlane.xlu0 %1182 }
 0xa82   :  { %v1187_v41 = vsub.f32 %v1179_v37, %v1183_v40 }
 0xa84   :  { %v1189_v42 = vmul.f32 1.442695, %v1187_v41 }
 0xa86   :  { %1928 = vpow2.f32 %v1189_v42 }
 0xa90   :  { %v1929_v43 = vpop.eup %1928 }
 0xa91   :  { %v1193_v45 = vsel %vm250_vm2, %v1929_v43, 0.0 }
 0xa92   :  { %1194 = vadd.xlane.f32.xlu0 %v1193_v45 }
 0xabf   :  { %v1068_v46 = vpop.f32.mrb[32].mxu1 }
 0xac0   :  { %v1075_v32 = vadd.f32 %v1068_v46, %v2511_v44  ;;  %v1818_v48 = vpop.f32.mrb[33].mxu1 }
 0xac1   :  { %v1071_v49 = vpop.f32.mrb[34].mxu1  ;;  %v1899_v48 = vld [vmem:[%s2638_s8 + $0x8] sm:$0xff]  }
 0xac2   :  { %v2556_v50 = vadd.f32 %v1071_v49, %v2513_v47  ;;  %v1819_v51 = vpop.f32.mrb[35].mxu1  ;;  %v1900_v49 = vld [vmem:[%s2640_s10] sm:$0xff]  }
 0xac7   :  { %v1171_v52 = vpop.f32.mrb[36].mxu1 }
 0xac8   :  { %v1178_v53 = vmul.f32 0.35355338, %v1171_v52  ;;  %v1830_v54 = vpop.f32.mrb[37].mxu1 }
 0xac9   :  { %v1174_v55 = vpop.f32.mrb[38].mxu1 }
 0xaca   :  { %v1831_v56 = vpop.f32.mrb[39].mxu1  ;;  %v1180_v57 = vsel %vm359_vm6, -1e+10, %v1178_v53 }
 0xacb   :  { %v1184_v58 = vsel %vm250_vm2, %v1180_v57, -inf }
 0xacc   :  { %1185 = vmax.xlane.f32.xlu1 %v1184_v58  ;;  %v1657_v58 = vld [vmem:[#allocation7] ss:$0 sm:$0xff] }
 0xadd   :  { %1205 = vrot.lane.b32.xlu1 %v2380_v11, %s2176_s22 }
 0xb1f   :  { %v1195_v44 = vpop.xlane.xlu0 %1194 }
 0xb20   :  { %1930 = vrcp.f32 %v1195_v44 }
 0xb2a   :  { %v1931_v59 = vpop.eup %1930 }
 0xb2b   :  { %v1201_v61 = vmul.f32 %v1931_v59, %v1929_v43 }
 0xb2d   :  { %v1203_v35 = vpack.c.bf16 %v1201_v61, %v1201_v61  ;;  %v1658_v61 = vld [vmem:[#allocation8] ss:$0 sm:$0xff] }
 0xb59   :  { %v1186_v47 = vpop.xlane.xlu1 %1185 }
 0xb5a   :  { %v1188_v60 = vsub.f32 %v1180_v57, %v1186_v47 }
 0xb5c   :  { %v1191_v62 = vmul.f32 1.442695, %v1188_v60 }
 0xb5d   :  { %v1206_v63 = vpop.permute.xlu1 %1205 }
 0xb5e   :  { %1932 = vpow2.f32 %v1191_v62  ;;  %v1211_v1 = vsel %vm391_vm7, %v1206_v63, 0 }
 0xb5f   :  { %1833 = vmatpush3.bf16.msra.mxu0 %v1211_v1 }
 0xb60   :  { %1844 = vmatprep.subr.bf16.mxu0 %v2162_v0 }
 0xb62   :  { %1835 = vmatmul.mubr.msk.bf16.vlgmr.msra.gmra.mrb[32].mxu0 %vm250_vm2, %v1203_v35 }
 0xb63   :  { %1846 = vmatprep.mubr.msk.bf16.mxu0 %vm2163_vm0, %v2162_v0  ;;  %1845 = vmatpush3.bf16.msra.mxu0 %v1306_v6 }
 0xb64   :  { %1858 = vmatprep.subr.bf16.mxu0 %v2162_v0 }
 0xb68   :  { %v1933_v11 = vpop.eup %1932 }
 0xb69   :  { %v1196_v2 = vsel %vm250_vm2, %v1933_v11, 0.0 }
 0xb6a   :  { %1197 = vadd.xlane.f32.xlu0 %v1196_v2  ;;  %v1903_v2 = vld [vmem:[%s2640_s10 + $0x18] sm:$0xff]  }
 0xb80   :  { %1253 = vrot.lane.b32.xlu0 %v2383_v14, %s2176_s22 }
 0xbf7   :  { %v1198_v7 = vpop.xlane.xlu0 %1197 }
 0xbf8   :  { %1934 = vrcp.f32 %v1198_v7 }
 0xbfb   :  { %v1254_v8 = vpop.permute.xlu0 %1253 }
 0xbfc   :  { %v1259_v9 = vsel %vm391_vm7, %v1254_v8, 0 }
 0xbfd   :  { %1839 = vmatpush3.bf16.msra.mxu1 %v1259_v9 }
 0xbfe   :  { %1850 = vmatprep.subr.bf16.mxu1 %v2162_v0 }
 0xc02   :  { %v1935_v10 = vpop.eup %1934 }
 0xc03   :  { %v1202_v12 = vmul.f32 %v1935_v10, %v1933_v11  ;;  %v1902_v11 = vld [vmem:[%s2640_s10 + $0x10] sm:$0xff]  }
 0xc05   :  { %v1204_v14 = vpack.c.bf16 %v1202_v12, %v1202_v12 }
 0xc07   :  { %1841 = vmatmul.mubr.msk.bf16.vlgmr.msra.gmra.mrb[40].mxu1 %vm250_vm2, %v1204_v14 }
 0xc08   :  { %1854 = vmatprep.mubr.msk.bf16.mxu1 %vm2163_vm0, %v2162_v0 }
 0xc35   :  { %v1247_v13 = vpop.f32.mrb[32].mxu0 }
 0xc36   :  { %v1836_v15 = vpop.f32.mrb[33].mxu0 }
 0xc37   :  { %v1250_v16 = vpop.f32.mrb[34].mxu0 }
 0xc38   :  { %v1837_v17 = vpop.f32.mrb[35].mxu0  ;;  %v1663_v16 = vld [vmem:[#allocation11] ss:$0 sm:$0xff] }
 0xcda   :  { %v1295_v18 = vpop.f32.mrb[40].mxu1 }
 0xcdb   :  { %v1301_v19 = vpack.c.bf16 %v1295_v18, %v1247_v13  ;;  %v1842_v20 = vpop.f32.mrb[41].mxu1 }
 0xcdc   :  { %v1298_v21 = vpop.f32.mrb[42].mxu1 }
 0xcdd   :  { %v1843_v22 = vpop.f32.mrb[43].mxu1  ;;  %1847 = vmatmul.mubr.msk.bf16.vlgmr.msra.gmra.mrb[36].mxu0 %vm250_vm2, %v1301_v19 }
 0xcde   :  { %1866 = vmatprep.mubr.msk.bf16.mxu0 %vm2163_vm0, %v2162_v0  ;;  %1859 = vmatpush3.bf16.msra.mxu0 %v1900_v49 }
 0xcdf   :  { %1860 = vmatprep.subr.bf16.mxu0 %v2162_v0 }
 0xdb0   :  { %v1342_v23 = vpop.f32.mrb[36].mxu0 }
 0xdb1   :  { %v1349_v25 = vadd.f32 %v1342_v23, %v1075_v32  ;;  %v1848_v26 = vpop.f32.mrb[37].mxu0 }
 0xdb2   :  { %v1345_v27 = vpop.f32.mrb[38].mxu0 }
 0xdb3   :  { %v1358_v28 = vadd.f32 %v1656_v24, %v1349_v25  ;;  %v1350_v29 = vadd.f32 %v1345_v27, %v2556_v50  ;;  %v1849_v30 = vpop.f32.mrb[39].mxu0  ;;  %v1901_v50 = vld [vmem:[%s2640_s10 + $0x8] sm:$0xff]   ;;  %s2177_s10 = smov [#allocation16]  }
 0xdb4   :  { %1861 = vmatpush3.bf16.msra.mxu0 %v1901_v50  ;;  %s1615_s9 = sshll.u32 %s2177_s10, 4  ;;  %s1616_s9 = int_to_ptr.vmem [resolvable:$true] %s1615_s9 }
 0xdb5   :  { %v1359_v31 = vadd.f32 %v1656_v24, %v1350_v29  ;;  %v1360_v33 = vadd.f32 %v1358_v28, %v2366_v3  ;;  %1862 = vmatprep.subr.bf16.mxu0 %v2162_v0  ;;  %s2120_s7 = scalar_lea.vmem %s1616_s9, 256  ;;  %p2125_p9 = scmp.lt.s32.totalorder %s1616_s9, %s1616_s9 }
 0xdb6   :  { %p2121_p8 = scmp.ne.s32.totalorder %s1616_s9, %s2120_s7  ;;  %p2126_p10 = scmp.lt.s32.totalorder %s2120_s7, %s2120_s7 }
 0xdb7   :  { %v1362_v34 = vsel %vm168_vm1, %v1360_v33, 0.0  ;;  %v1361_v36 = vadd.f32 %v1359_v31, %v2371_v4  ;;  %v1898_v4 = vld [vmem:[%s2638_s8] sm:$0xff]  }
 0xdb8   :  { %1363 = vadd.xlane.f32.xlu1 %v1362_v34  ;;  %1851 = vmatpush3.bf16.msra.mxu1 %v1898_v4  ;;  %v1670_v4 = vld [vmem:[#allocation14] ss:$0 sm:$0xff]  ;;  %p2127_p11 = por %p2126_p10, %p2125_p9 }
 0xdb9   :  { %v1365_v37 = vsel %vm168_vm1, %v1361_v36, 0.0  ;;  %1852 = vmatprep.subr.bf16.mxu1 %v2162_v0  ;;  %1863 = vmatpush3.bf16.msra.mxu0 %v1902_v11 }
 0xdba   :  { %1366 = vadd.xlane.f32.xlu0 %v1365_v37  ;;  %1864 = vmatprep.subr.bf16.mxu0 %v2162_v0  ;;  %p2128_p12 = pnand %p2127_p11, %p2121_p8 }
 0xdbc   :  { %1853 = vmatpush3.bf16.msra.mxu1 %v1899_v48 }
 0xdbd   :  { %1865 = vmatpush3.bf16.msra.mxu0 %v1903_v2 }
 0xe45   :  { %v1364_v38 = vpop.xlane.xlu1 %1363 }
 0xe46   :  { %v1369_v39 = vmul.f32 0.03125, %v1364_v38 }
 0xe47   :  { %v1367_v40 = vpop.xlane.xlu0 %1366 }
 0xe48   :  { %v1371_v41 = vsub.f32 %v1360_v33, %v1369_v39  ;;  %v1370_v42 = vmul.f32 0.03125, %v1367_v40 }
 0xe4a   :  { %v1372_v43 = vsub.f32 %v1361_v36, %v1370_v42  ;;  %v1373_v45 = vmul.f32 %v1371_v41, %v1371_v41 }
 0xe4c   :  { %v1375_v46 = vsel %vm168_vm1, %v1373_v45, 0.0  ;;  %v1374_v32 = vmul.f32 %v1372_v43, %v1372_v43 }
 0xe4d   :  { %1376 = vadd.xlane.f32.xlu1 %v1375_v46  ;;  %v1669_v46 = vld [vmem:[#allocation13] ss:$0 sm:$0xff] }
 0xe4e   :  { %v1378_v3 = vsel %vm168_vm1, %v1374_v32, 0.0 }
 0xe4f   :  { %1379 = vadd.xlane.f32.xlu0 %v1378_v3 }
 0xeda   :  { %v1377_v51 = vpop.xlane.xlu1 %1376 }
 0xedb   :  { %v1381_v52 = vmul.f32 0.03125, %v1377_v51 }
 0xedc   :  { %v1380_v53 = vpop.xlane.xlu0 %1379 }
 0xedd   :  { %v1383_v54 = vadd.f32 1e-05, %v1381_v52  ;;  %v1382_v55 = vmul.f32 0.03125, %v1380_v53 }
 0xedf   :  { %1936 = vrsqrt.f32 %v1383_v54  ;;  %v1384_v56 = vadd.f32 1e-05, %v1382_v55 }
 0xee1   :  { %1938 = vrsqrt.f32 %v1384_v56 }
 0xee9   :  { %v1937_v57 = vpop.eup %1936 }
 0xeea   :  { %v1387_v44 = vmul.f32 %v1937_v57, %v1371_v41 }
 0xeeb   :  { %v1939_v59 = vpop.eup %1938 }
 0xeec   :  { %v1396_v47 = vmul.f32 %v1657_v58, %v1387_v44  ;;  %v1388_v60 = vmul.f32 %v1939_v59, %v1372_v43 }
 0xeee   :  { %v1397_v62 = vmul.f32 %v1657_v58, %v1388_v60  ;;  %v1405_v63 = vadd.f32 %v1658_v61, %v1396_v47 }
 0xef0   :  { %v1406_v1 = vadd.f32 %v1658_v61, %v1397_v62 }
 0xef2   :  { %v1407_v35 = vpack.c.bf16 %v1406_v1, %v1405_v63 }
 0xef4   :  { %1855 = vmatmul.mubr.msk.bf16.vlgmr.msra.gmra.mrb[44].mxu1 %vm168_vm1, %v1407_v35 }
 0xfc7   :  { %v1468_v6 = vpop.f32.mrb[44].mxu1 }
 0xfc8   :  { %v1469_v7 = vadd.f32 %v1659_v5, %v1468_v6  ;;  %v1856_v8 = vpop.f32.mrb[45].mxu1 }
 0xfc9   :  { %v1471_v9 = vpop.f32.mrb[46].mxu1 }
 0xfca   :  { %v1472_v10 = vadd.f32 %v1659_v5, %v1471_v9  ;;  %v1857_v12 = vpop.f32.mrb[47].mxu1  ;;  %v1475_v14 = vmax.f32 %v1469_v7, 0.0 }
 0xfcc   :  { %v1476_v13 = vmax.f32 %v1472_v10, 0.0 }
 0xfce   :  { %v1477_v15 = vpack.c.bf16 %v1476_v13, %v1475_v14 }
 0xfd0   :  { %1867 = vmatmul.mubr.msk.bf16.vlgmr.msra.gmra.mrb[40].mxu0 %vm1517_vm8, %v1477_v15 }
0x10a3   :  { %v1555_v17 = vpop.f32.mrb[40].mxu0 }
0x10a4   :  { %v1556_v0 = vadd.f32 %v1663_v16, %v1555_v17  ;;  %v1868_v18 = vpop.f32.mrb[41].mxu0 }
0x10a5   :  { %v1558_v19 = vpop.f32.mrb[42].mxu0 }
0x10a6   :  { %v1559_v20 = vadd.f32 %v1663_v16, %v1558_v19  ;;  %v1869_v21 = vpop.f32.mrb[43].mxu0  ;;  %v1562_v22 = vadd.f32 %v1556_v0, %v1405_v63 }
0x10a8   :  { %v1564_v23 = vsel %vm168_vm1, %v1562_v22, 0.0  ;;  %v1563_v24 = vadd.f32 %v1559_v20, %v1406_v1 }
0x10a9   :  { %1565 = vadd.xlane.f32.xlu1 %v1564_v23 }
0x10aa   :  { %v1567_v25 = vsel %vm168_vm1, %v1563_v24, 0.0 }
0x10ab   :  { %1568 = vadd.xlane.f32.xlu0 %v1567_v25 }
0x1136   :  { %v1566_v26 = vpop.xlane.xlu1 %1565 }
0x1137   :  { %v1570_v27 = vmul.f32 0.03125, %v1566_v26 }
0x1138   :  { %v1569_v28 = vpop.xlane.xlu0 %1568 }
0x1139   :  { %v1572_v29 = vsub.f32 %v1562_v22, %v1570_v27  ;;  %v1571_v30 = vmul.f32 0.03125, %v1569_v28 }
0x113b   :  { %v1573_v31 = vsub.f32 %v1563_v24, %v1571_v30  ;;  %v1574_v33 = vmul.f32 %v1572_v29, %v1572_v29 }
0x113d   :  { %v1576_v34 = vsel %vm168_vm1, %v1574_v33, 0.0  ;;  %v1575_v36 = vmul.f32 %v1573_v31, %v1573_v31 }
0x113e   :  { %1577 = vadd.xlane.f32.xlu1 %v1576_v34 }
0x113f   :  { %v1579_v37 = vsel %vm168_vm1, %v1575_v36, 0.0 }
0x1140   :  { %1580 = vadd.xlane.f32.xlu0 %v1579_v37 }
0x11cb   :  { %v1578_v38 = vpop.xlane.xlu1 %1577 }
0x11cc   :  { %v1582_v39 = vmul.f32 0.03125, %v1578_v38 }
0x11cd   :  { %v1581_v40 = vpop.xlane.xlu0 %1580 }
0x11ce   :  { %v1584_v41 = vadd.f32 1e-05, %v1582_v39  ;;  %v1583_v42 = vmul.f32 0.03125, %v1581_v40 }
0x11d0   :  { %1940 = vrsqrt.f32 %v1584_v41  ;;  %v1585_v43 = vadd.f32 1e-05, %v1583_v42 }
0x11d2   :  { %1942 = vrsqrt.f32 %v1585_v43 }
0x11da   :  { %v1941_v45 = vpop.eup %1940 }
0x11db   :  { %v1588_v32 = vmul.f32 %v1941_v45, %v1572_v29 }
0x11dc   :  { %v1943_v3 = vpop.eup %1942 }
0x11dd   :  { %v1597_v48 = vmul.f32 %v1669_v46, %v1588_v32  ;;  %v1589_v49 = vmul.f32 %v1943_v3, %v1573_v31 }
0x11df   :  { %v1598_v50 = vmul.f32 %v1669_v46, %v1589_v49  ;;  %v1606_v51 = vadd.f32 %v1670_v4, %v1597_v48 }
0x11e1   :  { %v1607_v52 = vadd.f32 %v1670_v4, %v1598_v50  ;;  %1608 = vst.msk [vmem:[#allocation16] sm:$0xff] %vm168_vm1, %v1606_v51 }
0x11e3   :  { %1609 = vst.msk [vmem:[#allocation16 + $0x8] sm:$0xff] %vm168_vm1, %v1607_v52 }
0x11e4   :  { %2131 = shalt.err (!%p2128_p12)
}
0x11e5   :  { %s2132_s24 = scalar_lea.hbm %s2644_s14, 256 }
0x11e6   :  { %p2133_p13 = scmp.ne.s32.totalorder %s2644_s14, %s2132_s24  ;;  %p2136_p0 = scmp.lt.u32.totalorder %s2132_s24, %s2644_s14 }
0x11e8   :  { %p2138_p1 = pnand %p2136_p0, %p2133_p13 }
0x11ea   :  { %2141 = shalt.err (!%p2138_p1)
}
0x11eb   :  { %s2178_s6 = smov 128   ;;  %s2179_s18 = smov 8  }
0x11ec   :  { %1621 = dma.vmem_to_hbm [thread:$0]  %s1616_s9, 256, %s2644_s14, [#allocation4], %s2178_s6, %s2178_s6, %s2179_s18  }
0x11ed   :  { %2152 = dma.done.wait [#allocation4], 256  }
0x11ee   :  { %2153 = vsyncadd [#allocation4], 4294967040 }
0x11ef   :  { %1625 = vsyncpa [#allocation3], 1 }
0x11f0   :  { %1626 = vsyncpa [#allocation6], 1 }
0x11f1   :  { %1627 = vsyncpa [#allocation9], 1 }
0x11f2   :  { %1628 = vsyncpa [#allocation12], 1 }
0x11f3   :  { %1629 = vsyncpa [#allocation15], 1 }
0x11f4   :  { %1630 = vsyncpa [#allocation4], 1 }

</bundles_post_ra>
